<compile_context>
chip_gen: v5e
topology: v5e:2x2
jax: 0.10.0
libtpu: 0.0.40
codegen_flags: <defaults>
</compile_context>

<pallas_src>
import math
import jax
import jax.numpy as jnp
from jax.experimental import pallas as pl
from jax.experimental.pallas import tpu as pltpu

NUM_HEADS = 4  # item_emb_dims must be divisible by this


def _round_up(x, m):
    return ((x + m - 1) // m) * m


# ---------------------------------------------------------------------------
# Pallas kernel: one grid step == TB batch elements.
# Fuses: QKV in-projection, per-head scaled-dot-product attention + softmax,
# output projection, additive attention with length mask, weighted pooling.
# ---------------------------------------------------------------------------
def _mha_recall_kernel(sizes_ref,             # VMEM (TB, 1) int32  history sizes
                       x_ref,                 # VMEM (TB, H, E)     embedded history
                       w_in_ref, b_in_ref,    # (E, 3E), (1, 3E)    MHA in_proj (pre-transposed)
                       w_out_ref, b_out_ref,  # (E, E),  (1, E)     MHA out_proj (pre-transposed)
                       w_add_ref, b_add_ref,  # (E, A),  (1, A)     additive proj (pre-transposed)
                       v_add_ref,             # (A, 1)              additive query vector
                       o_ref):                # VMEM (TB, E)        pooled output
    x = x_ref[...]
    TB, H, E = x.shape
    d = E // NUM_HEADS
    scale = 1.0 / math.sqrt(d)

    # ---- MHA in-projection on the flattened (TB*H, E) slab -----------------
    x2 = x.reshape(TB * H, E)
    qkv = (jnp.dot(x2, w_in_ref[...], preferred_element_type=jnp.float32)
           + b_in_ref[...])                                        # (TB*H, 3E) f32
    q3 = qkv[:, :E].reshape(TB, H, E) * scale                      # leading-dim split: free
    k3 = qkv[:, E:2 * E].reshape(TB, H, E)
    v3 = qkv[:, 2 * E:].reshape(TB, H, E)

    # ---- per-head scaled-dot-product attention, batched over TB ------------
    head_ctx = []
    for h in range(NUM_HEADS):                                     # static unroll (4)
        sl = slice(h * d, (h + 1) * d)
        s = jnp.einsum("bqd,bkd->bqk", q3[..., sl], k3[..., sl],
                       preferred_element_type=jnp.float32)         # (TB, H, H)
        s = s - jnp.max(s, axis=-1, keepdims=True)
        p = jnp.exp(s)
        p = p * pl.reciprocal(jnp.sum(p, axis=-1, keepdims=True), approx=True)
        head_ctx.append(jnp.einsum("bqk,bkd->bqd", p, v3[..., sl],
                                   preferred_element_type=jnp.float32))
    ctx = jnp.concatenate(head_ctx, axis=-1)                       # (TB, H, E)

    # ---- MHA out-projection (flattened) -------------------------------------
    attn = (jnp.dot(ctx.reshape(TB * H, E), w_out_ref[...],
                    preferred_element_type=jnp.float32)
            + b_out_ref[...])                                       # (TB*H, E)

    # ---- AdditiveAttention: tanh projection + masked softmax pooling -------
    proj = jnp.tanh(jnp.dot(attn, w_add_ref[...],
                            preferred_element_type=jnp.float32)
                    + b_add_ref[...])                               # (TB*H, A)
    score = jnp.dot(proj, v_add_ref[...],
                    preferred_element_type=jnp.float32).reshape(TB, H, 1)

    pos = jax.lax.broadcasted_iota(jnp.int32, (TB, H, 1), 1)        # position along H
    size = sizes_ref[...][:, None, :]                               # (TB, 1, 1)
    score = jnp.where(pos >= size, -1e30, score)

    m = jnp.max(score, axis=1, keepdims=True)                       # (TB, 1, 1)
    e = jnp.exp(score - m)
    alpha = e * pl.reciprocal(jnp.sum(e, axis=1, keepdims=True), approx=True)  # (TB, H, 1)

    pooled = jnp.sum(alpha * attn.reshape(TB, H, E), axis=1)        # (TB, E)
    o_ref[...] = pooled.astype(o_ref.dtype)


# ---------------------------------------------------------------------------
# Wrapper: embedding gather (glue), weight pre-transpose, batch tiling/padding.
# ---------------------------------------------------------------------------
def mha_recall_forward(params, history, history_sizes, *,
                       tile_batch=1024, compute_dtype=jnp.float32):
    # compute_dtype=jnp.bfloat16 halves HBM traffic on v6e/v7x (accumulation
    # stays f32 inside the kernel); default f32 to match the f32 reference.
    emb = params["item_emb"][history].astype(compute_dtype)         # (B, H, E) gather (glue)
    B, H, E = emb.shape
    A = params["add_w"].shape[0]

    # Batch tile: multiple of 8 (sublane-aligned output block); pad B up.
    TB = _round_up(min(tile_batch, _round_up(B, 8)), 8)
    B_pad = _round_up(B, TB)
    if B_pad != B:
        emb = jnp.pad(emb, ((0, B_pad - B), (0, 0), (0, 0)))
        history_sizes = jnp.pad(history_sizes, (0, B_pad - B), constant_values=H)
    sizes = history_sizes.astype(jnp.int32).reshape(B_pad, 1)

    # Pre-transpose / reshape weights once (host/XLA) -> no in-kernel .T.
    w_in_t = params["mha_w_in"].T.astype(compute_dtype)              # (E, 3E)
    b_in = params["mha_b_in"].reshape(1, -1).astype(compute_dtype)   # (1, 3E)
    w_out_t = params["mha_w_out"].T.astype(compute_dtype)            # (E, E)
    b_out = params["mha_b_out"].reshape(1, -1).astype(compute_dtype)  # (1, E)
    w_add_t = params["add_w"].T.astype(compute_dtype)                # (E, A)
    b_add = params["add_b"].reshape(1, -1).astype(compute_dtype)     # (1, A)
    v_add = params["add_q"].reshape(-1, 1).astype(compute_dtype)     # (A, 1)

    out = pl.pallas_call(
        _mha_recall_kernel,
        out_shape=jax.ShapeDtypeStruct((B_pad, E), jnp.float32),
        grid_spec=pltpu.PrefetchScalarGridSpec(
            num_scalar_prefetch=0,
            grid=(B_pad // TB,),
            in_specs=[
                pl.BlockSpec((TB, 1), lambda i: (i, 0)),             # history sizes
                pl.BlockSpec((TB, H, E), lambda i: (i, 0, 0)),       # embedded history slab
                pl.BlockSpec((E, 3 * E), lambda i: (0, 0)),          # mha in_proj W^T
                pl.BlockSpec((1, 3 * E), lambda i: (0, 0)),          # mha in_proj b
                pl.BlockSpec((E, E), lambda i: (0, 0)),              # mha out_proj W^T
                pl.BlockSpec((1, E), lambda i: (0, 0)),              # mha out_proj b
                pl.BlockSpec((E, A), lambda i: (0, 0)),              # additive W^T
                pl.BlockSpec((1, A), lambda i: (0, 0)),              # additive b
                pl.BlockSpec((A, 1), lambda i: (0, 0)),              # additive query
            ],
            out_specs=pl.BlockSpec((TB, E), lambda i: (i, 0)),       # lane-contiguous 2-D slab
        ),
        compiler_params=pltpu.CompilerParams(
            dimension_semantics=("parallel",)),                      # megacore-shardable batch axis
    )(sizes, emb, w_in_t, b_in, w_out_t, b_out, w_add_t, b_add, v_add)
    return out[:B]                                                   # (B, E)


# ---------------------------------------------------------------------------
# Deterministic parameter init (shapes per the module's __init__).
# ---------------------------------------------------------------------------
def init_params(key, num_items, item_emb_dims, additive_atten_dims):
    E, A = item_emb_dims, additive_atten_dims
    ks = jax.random.split(key, 8)
    return dict(
        item_emb=jax.random.normal(ks[0], (num_items, E), jnp.float32),
        mha_w_in=jax.random.normal(ks[1], (3 * E, E), jnp.float32) * 0.1,
        mha_b_in=jax.random.normal(ks[2], (3 * E,), jnp.float32) * 0.01,
        mha_w_out=jax.random.normal(ks[3], (E, E), jnp.float32) * 0.1,
        mha_b_out=jax.random.normal(ks[4], (E,), jnp.float32) * 0.01,
        add_w=jax.random.normal(ks[5], (A, E), jnp.float32) * 0.1,
        add_b=jax.random.normal(ks[6], (A,), jnp.float32) * 0.01,
        add_q=jax.random.normal(ks[7], (A,), jnp.float32) * 0.1,
    )


# ---------------------------------------------------------------------------
# Pure-JAX reference of the same forward, for the correctness check.
# ---------------------------------------------------------------------------
def reference_forward(params, history, history_sizes):
    x = params["item_emb"][history].astype(jnp.float32)              # (B, H, E)
    B, H, E = x.shape
    d = E // NUM_HEADS
    qkv = jnp.einsum("bhe,fe->bhf", x, params["mha_w_in"]) + params["mha_b_in"]
    q, k, v = qkv[..., :E], qkv[..., E:2 * E], qkv[..., 2 * E:]
    q = q.reshape(B, H, NUM_HEADS, d) * (1.0 / math.sqrt(d))
    k = k.reshape(B, H, NUM_HEADS, d)
    v = v.reshape(B, H, NUM_HEADS, d)
    s = jnp.einsum("bqnd,bknd->bnqk", q, k)
    p = jax.nn.softmax(s, axis=-1)
    o = jnp.einsum("bnqk,bknd->bqnd", p, v).reshape(B, H, E)
    o = jnp.einsum("bhe,fe->bhf", o, params["mha_w_out"]) + params["mha_b_out"]
    proj = jnp.tanh(jnp.einsum("bhe,ae->bha", o, params["add_w"]) + params["add_b"])
    score = jnp.einsum("bha,a->bh", proj, params["add_q"])
    mask = jnp.arange(H)[None, :] >= history_sizes[:, None]
    score = jnp.where(mask, -1e30, score)
    alpha = jax.nn.softmax(score, axis=-1)
    return jnp.einsum("bh,bhe->be", alpha, o)


if __name__ == "__main__":
    num_items, item_emb_dims, additive_atten_dims = 100, 32, 64
    batch, history_len = 2, 8

    key = jax.random.PRNGKey(0)
    pkey, hkey = jax.random.split(key)
    params = init_params(pkey, num_items, item_emb_dims, additive_atten_dims)

    history = jax.random.randint(hkey, (batch, history_len), 0, num_items)
    history_sizes = jnp.array([5, 8], dtype=jnp.int32)

    out = mha_recall_forward(params, history, history_sizes)
    out = jax.block_until_ready(out)

    ref = reference_forward(params, history, history_sizes)
    assert out.shape == (batch, item_emb_dims)
    # Tolerance loosened from 1e-4: the kernel uses pl.reciprocal(approx=True)
    # for the softmax denominators (EUP approximate reciprocal).
    assert jnp.allclose(out, ref, rtol=2e-3, atol=2e-3), "kernel/reference mismatch"
    print("KERNEL_OK")
</pallas_src>

<mosaic_0001>
module attributes {stable_mosaic.version = 11 : i64} {
  func.func @_mha_recall_kernel(%arg0: i32, %arg1: memref<8x1xi32, #tpu.memory_space<vmem>>, %arg2: memref<8x8x32xf32, #tpu.memory_space<vmem>>, %arg3: memref<32x96xf32, #tpu.memory_space<vmem>>, %arg4: memref<1x96xf32, #tpu.memory_space<vmem>>, %arg5: memref<32x32xf32, #tpu.memory_space<vmem>>, %arg6: memref<1x32xf32, #tpu.memory_space<vmem>>, %arg7: memref<32x64xf32, #tpu.memory_space<vmem>>, %arg8: memref<1x64xf32, #tpu.memory_space<vmem>>, %arg9: memref<64x1xf32, #tpu.memory_space<vmem>>, %arg10: memref<8x32xf32, #tpu.memory_space<vmem>>) attributes {dimension_semantics = [#tpu.dimension_semantics<parallel>], iteration_bounds = array<i64: 1>, scalar_prefetch = 0 : i64, scratch_operands = 0 : i64, tpu.core_type = #tpu.core_type<tc>, window_params = [{transform_indices = @transform_0, window_bounds = array<i64: 8, 1>}, {transform_indices = @transform_1, window_bounds = array<i64: 8, 8, 32>}, {pipeline_mode = #tpu.pipeline_mode<synchronous>, transform_indices = @transform_2, window_bounds = array<i64: 32, 96>}, {pipeline_mode = #tpu.pipeline_mode<synchronous>, transform_indices = @transform_3, window_bounds = array<i64: 1, 96>}, {pipeline_mode = #tpu.pipeline_mode<synchronous>, transform_indices = @transform_4, window_bounds = array<i64: 32, 32>}, {pipeline_mode = #tpu.pipeline_mode<synchronous>, transform_indices = @transform_5, window_bounds = array<i64: 1, 32>}, {pipeline_mode = #tpu.pipeline_mode<synchronous>, transform_indices = @transform_6, window_bounds = array<i64: 32, 64>}, {pipeline_mode = #tpu.pipeline_mode<synchronous>, transform_indices = @transform_7, window_bounds = array<i64: 1, 64>}, {pipeline_mode = #tpu.pipeline_mode<synchronous>, transform_indices = @transform_8, window_bounds = array<i64: 64, 1>}, {transform_indices = @transform_9, window_bounds = array<i64: 8, 32>}]} {
    %c0 = arith.constant 0 : index
    %c0_0 = arith.constant 0 : index
    %c0_1 = arith.constant 0 : index
    %0 = vector.load %arg2[%c0, %c0_0, %c0_1] : memref<8x8x32xf32, #tpu.memory_space<vmem>>, vector<8x8x32xf32>
    %1 = vector.shape_cast %0 : vector<8x8x32xf32> to vector<64x32xf32>
    %c0_2 = arith.constant 0 : index
    %c0_3 = arith.constant 0 : index
    %2 = vector.load %arg3[%c0_2, %c0_3] : memref<32x96xf32, #tpu.memory_space<vmem>>, vector<32x96xf32>
    %cst = arith.constant dense<0.000000e+00> : vector<64x96xf32>
    %3 = tpu.matmul %1, %2, %cst {dimension_numbers = #tpu.dot_dimension_numbers<[1], [0], [0], [1], [0, 0, 1, 1], [], []>} : vector<64x32xf32>, vector<32x96xf32>, vector<64x96xf32> -> vector<64x96xf32>
    %c0_4 = arith.constant 0 : index
    %c0_5 = arith.constant 0 : index
    %4 = vector.load %arg4[%c0_4, %c0_5] : memref<1x96xf32, #tpu.memory_space<vmem>>, vector<1x96xf32>
    %5 = vector.broadcast %4 : vector<1x96xf32> to vector<64x96xf32>
    %6 = arith.addf %3, %5 : vector<64x96xf32>
    %7 = vector.extract_strided_slice %6 {offsets = [0, 0], sizes = [64, 32], strides = [1, 1]} : vector<64x96xf32> to vector<64x32xf32>
    %8 = vector.shape_cast %7 : vector<64x32xf32> to vector<8x8x32xf32>
    %cst_6 = arith.constant 0.353553385 : f32
    %9 = vector.broadcast %cst_6 : f32 to vector<8x8x32xf32>
    %10 = arith.mulf %8, %9 : vector<8x8x32xf32>
    %11 = vector.extract_strided_slice %6 {offsets = [0, 32], sizes = [64, 32], strides = [1, 1]} : vector<64x96xf32> to vector<64x32xf32>
    %12 = vector.shape_cast %11 : vector<64x32xf32> to vector<8x8x32xf32>
    %13 = vector.extract_strided_slice %6 {offsets = [0, 64], sizes = [64, 32], strides = [1, 1]} : vector<64x96xf32> to vector<64x32xf32>
    %14 = vector.shape_cast %13 : vector<64x32xf32> to vector<8x8x32xf32>
    %15 = vector.extract_strided_slice %10 {offsets = [0, 0, 0], sizes = [8, 8, 8], strides = [1, 1, 1]} : vector<8x8x32xf32> to vector<8x8x8xf32>
    %16 = vector.extract_strided_slice %12 {offsets = [0, 0, 0], sizes = [8, 8, 8], strides = [1, 1, 1]} : vector<8x8x32xf32> to vector<8x8x8xf32>
    "tpu.trace_start"() <{level = 10 : i32, message = "bqd,bkd->bqk"}> : () -> ()
    %cst_7 = arith.constant dense<0.000000e+00> : vector<8x8x8xf32>
    %17 = tpu.matmul %15, %16, %cst_7 {dimension_numbers = #tpu.dot_dimension_numbers<[2], [2], [1], [1], [0, 0, 0, 1, 1, 1], [0], [0]>} : vector<8x8x8xf32>, vector<8x8x8xf32>, vector<8x8x8xf32> -> vector<8x8x8xf32>
    "tpu.trace_stop"() : () -> ()
    %cst_8 = arith.constant dense<0xFF800000> : vector<8x8xf32>
    %18 = vector.multi_reduction <maximumf>, %17, %cst_8 [2] : vector<8x8x8xf32> to vector<8x8xf32>
    %19 = vector.shape_cast %18 : vector<8x8xf32> to vector<8x8x1xf32>
    %20 = vector.broadcast %19 : vector<8x8x1xf32> to vector<8x8x8xf32>
    %21 = arith.subf %17, %20 : vector<8x8x8xf32>
    %22 = math.exp %21 : vector<8x8x8xf32>
    %cst_9 = arith.constant dense<0.000000e+00> : vector<8x8xf32>
    %23 = vector.multi_reduction <add>, %22, %cst_9 [2] : vector<8x8x8xf32> to vector<8x8xf32>
    %24 = vector.shape_cast %23 : vector<8x8xf32> to vector<8x8x1xf32>
    %25 = tpu.reciprocal %24 {approx = true} : vector<8x8x1xf32> -> vector<8x8x1xf32>
    %26 = vector.broadcast %25 : vector<8x8x1xf32> to vector<8x8x8xf32>
    %27 = arith.mulf %22, %26 : vector<8x8x8xf32>
    %28 = vector.extract_strided_slice %14 {offsets = [0, 0, 0], sizes = [8, 8, 8], strides = [1, 1, 1]} : vector<8x8x32xf32> to vector<8x8x8xf32>
    "tpu.trace_start"() <{level = 10 : i32, message = "bqk,bkd->bqd"}> : () -> ()
    %cst_10 = arith.constant dense<0.000000e+00> : vector<8x8x8xf32>
    %29 = tpu.matmul %27, %28, %cst_10 {dimension_numbers = #tpu.dot_dimension_numbers<[2], [1], [1], [2], [0, 0, 0, 1, 1, 2], [0], [0]>} : vector<8x8x8xf32>, vector<8x8x8xf32>, vector<8x8x8xf32> -> vector<8x8x8xf32>
    "tpu.trace_stop"() : () -> ()
    %30 = vector.extract_strided_slice %10 {offsets = [0, 0, 8], sizes = [8, 8, 8], strides = [1, 1, 1]} : vector<8x8x32xf32> to vector<8x8x8xf32>
    %31 = vector.extract_strided_slice %12 {offsets = [0, 0, 8], sizes = [8, 8, 8], strides = [1, 1, 1]} : vector<8x8x32xf32> to vector<8x8x8xf32>
    "tpu.trace_start"() <{level = 10 : i32, message = "bqd,bkd->bqk"}> : () -> ()
    %cst_11 = arith.constant dense<0.000000e+00> : vector<8x8x8xf32>
    %32 = tpu.matmul %30, %31, %cst_11 {dimension_numbers = #tpu.dot_dimension_numbers<[2], [2], [1], [1], [0, 0, 0, 1, 1, 1], [0], [0]>} : vector<8x8x8xf32>, vector<8x8x8xf32>, vector<8x8x8xf32> -> vector<8x8x8xf32>
    "tpu.trace_stop"() : () -> ()
    %cst_12 = arith.constant dense<0xFF800000> : vector<8x8xf32>
    %33 = vector.multi_reduction <maximumf>, %32, %cst_12 [2] : vector<8x8x8xf32> to vector<8x8xf32>
    %34 = vector.shape_cast %33 : vector<8x8xf32> to vector<8x8x1xf32>
    %35 = vector.broadcast %34 : vector<8x8x1xf32> to vector<8x8x8xf32>
    %36 = arith.subf %32, %35 : vector<8x8x8xf32>
    %37 = math.exp %36 : vector<8x8x8xf32>
    %cst_13 = arith.constant dense<0.000000e+00> : vector<8x8xf32>
    %38 = vector.multi_reduction <add>, %37, %cst_13 [2] : vector<8x8x8xf32> to vector<8x8xf32>
    %39 = vector.shape_cast %38 : vector<8x8xf32> to vector<8x8x1xf32>
    %40 = tpu.reciprocal %39 {approx = true} : vector<8x8x1xf32> -> vector<8x8x1xf32>
    %41 = vector.broadcast %40 : vector<8x8x1xf32> to vector<8x8x8xf32>
    %42 = arith.mulf %37, %41 : vector<8x8x8xf32>
    %43 = vector.extract_strided_slice %14 {offsets = [0, 0, 8], sizes = [8, 8, 8], strides = [1, 1, 1]} : vector<8x8x32xf32> to vector<8x8x8xf32>
    "tpu.trace_start"() <{level = 10 : i32, message = "bqk,bkd->bqd"}> : () -> ()
    %cst_14 = arith.constant dense<0.000000e+00> : vector<8x8x8xf32>
    %44 = tpu.matmul %42, %43, %cst_14 {dimension_numbers = #tpu.dot_dimension_numbers<[2], [1], [1], [2], [0, 0, 0, 1, 1, 2], [0], [0]>} : vector<8x8x8xf32>, vector<8x8x8xf32>, vector<8x8x8xf32> -> vector<8x8x8xf32>
    "tpu.trace_stop"() : () -> ()
    %45 = vector.extract_strided_slice %10 {offsets = [0, 0, 16], sizes = [8, 8, 8], strides = [1, 1, 1]} : vector<8x8x32xf32> to vector<8x8x8xf32>
    %46 = vector.extract_strided_slice %12 {offsets = [0, 0, 16], sizes = [8, 8, 8], strides = [1, 1, 1]} : vector<8x8x32xf32> to vector<8x8x8xf32>
    "tpu.trace_start"() <{level = 10 : i32, message = "bqd,bkd->bqk"}> : () -> ()
    %cst_15 = arith.constant dense<0.000000e+00> : vector<8x8x8xf32>
    %47 = tpu.matmul %45, %46, %cst_15 {dimension_numbers = #tpu.dot_dimension_numbers<[2], [2], [1], [1], [0, 0, 0, 1, 1, 1], [0], [0]>} : vector<8x8x8xf32>, vector<8x8x8xf32>, vector<8x8x8xf32> -> vector<8x8x8xf32>
    "tpu.trace_stop"() : () -> ()
    %cst_16 = arith.constant dense<0xFF800000> : vector<8x8xf32>
    %48 = vector.multi_reduction <maximumf>, %47, %cst_16 [2] : vector<8x8x8xf32> to vector<8x8xf32>
    %49 = vector.shape_cast %48 : vector<8x8xf32> to vector<8x8x1xf32>
    %50 = vector.broadcast %49 : vector<8x8x1xf32> to vector<8x8x8xf32>
    %51 = arith.subf %47, %50 : vector<8x8x8xf32>
    %52 = math.exp %51 : vector<8x8x8xf32>
    %cst_17 = arith.constant dense<0.000000e+00> : vector<8x8xf32>
    %53 = vector.multi_reduction <add>, %52, %cst_17 [2] : vector<8x8x8xf32> to vector<8x8xf32>
    %54 = vector.shape_cast %53 : vector<8x8xf32> to vector<8x8x1xf32>
    %55 = tpu.reciprocal %54 {approx = true} : vector<8x8x1xf32> -> vector<8x8x1xf32>
    %56 = vector.broadcast %55 : vector<8x8x1xf32> to vector<8x8x8xf32>
    %57 = arith.mulf %52, %56 : vector<8x8x8xf32>
    %58 = vector.extract_strided_slice %14 {offsets = [0, 0, 16], sizes = [8, 8, 8], strides = [1, 1, 1]} : vector<8x8x32xf32> to vector<8x8x8xf32>
    "tpu.trace_start"() <{level = 10 : i32, message = "bqk,bkd->bqd"}> : () -> ()
    %cst_18 = arith.constant dense<0.000000e+00> : vector<8x8x8xf32>
    %59 = tpu.matmul %57, %58, %cst_18 {dimension_numbers = #tpu.dot_dimension_numbers<[2], [1], [1], [2], [0, 0, 0, 1, 1, 2], [0], [0]>} : vector<8x8x8xf32>, vector<8x8x8xf32>, vector<8x8x8xf32> -> vector<8x8x8xf32>
    "tpu.trace_stop"() : () -> ()
    %60 = vector.extract_strided_slice %10 {offsets = [0, 0, 24], sizes = [8, 8, 8], strides = [1, 1, 1]} : vector<8x8x32xf32> to vector<8x8x8xf32>
    %61 = vector.extract_strided_slice %12 {offsets = [0, 0, 24], sizes = [8, 8, 8], strides = [1, 1, 1]} : vector<8x8x32xf32> to vector<8x8x8xf32>
    "tpu.trace_start"() <{level = 10 : i32, message = "bqd,bkd->bqk"}> : () -> ()
    %cst_19 = arith.constant dense<0.000000e+00> : vector<8x8x8xf32>
    %62 = tpu.matmul %60, %61, %cst_19 {dimension_numbers = #tpu.dot_dimension_numbers<[2], [2], [1], [1], [0, 0, 0, 1, 1, 1], [0], [0]>} : vector<8x8x8xf32>, vector<8x8x8xf32>, vector<8x8x8xf32> -> vector<8x8x8xf32>
    "tpu.trace_stop"() : () -> ()
    %cst_20 = arith.constant dense<0xFF800000> : vector<8x8xf32>
    %63 = vector.multi_reduction <maximumf>, %62, %cst_20 [2] : vector<8x8x8xf32> to vector<8x8xf32>
    %64 = vector.shape_cast %63 : vector<8x8xf32> to vector<8x8x1xf32>
    %65 = vector.broadcast %64 : vector<8x8x1xf32> to vector<8x8x8xf32>
    %66 = arith.subf %62, %65 : vector<8x8x8xf32>
    %67 = math.exp %66 : vector<8x8x8xf32>
    %cst_21 = arith.constant dense<0.000000e+00> : vector<8x8xf32>
    %68 = vector.multi_reduction <add>, %67, %cst_21 [2] : vector<8x8x8xf32> to vector<8x8xf32>
    %69 = vector.shape_cast %68 : vector<8x8xf32> to vector<8x8x1xf32>
    %70 = tpu.reciprocal %69 {approx = true} : vector<8x8x1xf32> -> vector<8x8x1xf32>
    %71 = vector.broadcast %70 : vector<8x8x1xf32> to vector<8x8x8xf32>
    %72 = arith.mulf %67, %71 : vector<8x8x8xf32>
    %73 = vector.extract_strided_slice %14 {offsets = [0, 0, 24], sizes = [8, 8, 8], strides = [1, 1, 1]} : vector<8x8x32xf32> to vector<8x8x8xf32>
    "tpu.trace_start"() <{level = 10 : i32, message = "bqk,bkd->bqd"}> : () -> ()
    %cst_22 = arith.constant dense<0.000000e+00> : vector<8x8x8xf32>
    %74 = tpu.matmul %72, %73, %cst_22 {dimension_numbers = #tpu.dot_dimension_numbers<[2], [1], [1], [2], [0, 0, 0, 1, 1, 2], [0], [0]>} : vector<8x8x8xf32>, vector<8x8x8xf32>, vector<8x8x8xf32> -> vector<8x8x8xf32>
    "tpu.trace_stop"() : () -> ()
    %75 = tpu.concatenate %29, %44, %59, %74 in 2 : vector<8x8x8xf32>, vector<8x8x8xf32>, vector<8x8x8xf32>, vector<8x8x8xf32> -> vector<8x8x32xf32>
    %76 = vector.shape_cast %75 : vector<8x8x32xf32> to vector<64x32xf32>
    %c0_23 = arith.constant 0 : index
    %c0_24 = arith.constant 0 : index
    %77 = vector.load %arg5[%c0_23, %c0_24] : memref<32x32xf32, #tpu.memory_space<vmem>>, vector<32x32xf32>
    %cst_25 = arith.constant dense<0.000000e+00> : vector<64x32xf32>
    %78 = tpu.matmul %76, %77, %cst_25 {dimension_numbers = #tpu.dot_dimension_numbers<[1], [0], [0], [1], [0, 0, 1, 1], [], []>} : vector<64x32xf32>, vector<32x32xf32>, vector<64x32xf32> -> vector<64x32xf32>
    %c0_26 = arith.constant 0 : index
    %c0_27 = arith.constant 0 : index
    %79 = vector.load %arg6[%c0_26, %c0_27] : memref<1x32xf32, #tpu.memory_space<vmem>>, vector<1x32xf32>
    %80 = vector.broadcast %79 : vector<1x32xf32> to vector<64x32xf32>
    %81 = arith.addf %78, %80 : vector<64x32xf32>
    %c0_28 = arith.constant 0 : index
    %c0_29 = arith.constant 0 : index
    %82 = vector.load %arg7[%c0_28, %c0_29] : memref<32x64xf32, #tpu.memory_space<vmem>>, vector<32x64xf32>
    %cst_30 = arith.constant dense<0.000000e+00> : vector<64x64xf32>
    %83 = tpu.matmul %81, %82, %cst_30 {dimension_numbers = #tpu.dot_dimension_numbers<[1], [0], [0], [1], [0, 0, 1, 1], [], []>} : vector<64x32xf32>, vector<32x64xf32>, vector<64x64xf32> -> vector<64x64xf32>
    %c0_31 = arith.constant 0 : index
    %c0_32 = arith.constant 0 : index
    %84 = vector.load %arg8[%c0_31, %c0_32] : memref<1x64xf32, #tpu.memory_space<vmem>>, vector<1x64xf32>
    %85 = vector.broadcast %84 : vector<1x64xf32> to vector<64x64xf32>
    %86 = arith.addf %83, %85 : vector<64x64xf32>
    %87 = math.tanh %86 : vector<64x64xf32>
    %c0_33 = arith.constant 0 : index
    %c0_34 = arith.constant 0 : index
    %88 = vector.load %arg9[%c0_33, %c0_34] : memref<64x1xf32, #tpu.memory_space<vmem>>, vector<64x1xf32>
    %cst_35 = arith.constant dense<0.000000e+00> : vector<64x1xf32>
    %89 = tpu.matmul %87, %88, %cst_35 {dimension_numbers = #tpu.dot_dimension_numbers<[1], [0], [0], [1], [0, 0, 1, 1], [], []>} : vector<64x64xf32>, vector<64x1xf32>, vector<64x1xf32> -> vector<64x1xf32>
    %90 = vector.shape_cast %89 : vector<64x1xf32> to vector<8x8x1xf32>
    %91 = tpu.iota {dimensions = array<i32: 1>} : vector<8x8x1xi32>
    %c0_36 = arith.constant 0 : index
    %c0_37 = arith.constant 0 : index
    %92 = vector.load %arg1[%c0_36, %c0_37] : memref<8x1xi32, #tpu.memory_space<vmem>>, vector<8x1xi32>
    %93 = vector.shape_cast %92 : vector<8x1xi32> to vector<8x1x1xi32>
    %94 = vector.broadcast %93 : vector<8x1x1xi32> to vector<8x8x1xi32>
    %95 = arith.cmpi sge, %91, %94 : vector<8x8x1xi32>
    %cst_38 = arith.constant -1.000000e+30 : f32
    %96 = vector.broadcast %cst_38 : f32 to vector<8x8x1xf32>
    %97 = arith.select %95, %96, %90 : vector<8x8x1xi1>, vector<8x8x1xf32>
    %cst_39 = arith.constant dense<0xFF800000> : vector<8x1xf32>
    %98 = vector.multi_reduction <maximumf>, %97, %cst_39 [1] : vector<8x8x1xf32> to vector<8x1xf32>
    %99 = vector.shape_cast %98 : vector<8x1xf32> to vector<8x1x1xf32>
    %100 = vector.broadcast %99 : vector<8x1x1xf32> to vector<8x8x1xf32>
    %101 = arith.subf %97, %100 : vector<8x8x1xf32>
    %102 = math.exp %101 : vector<8x8x1xf32>
    %cst_40 = arith.constant dense<0.000000e+00> : vector<8x1xf32>
    %103 = vector.multi_reduction <add>, %102, %cst_40 [1] : vector<8x8x1xf32> to vector<8x1xf32>
    %104 = vector.shape_cast %103 : vector<8x1xf32> to vector<8x1x1xf32>
    %105 = tpu.reciprocal %104 {approx = true} : vector<8x1x1xf32> -> vector<8x1x1xf32>
    %106 = vector.broadcast %105 : vector<8x1x1xf32> to vector<8x8x1xf32>
    %107 = arith.mulf %102, %106 : vector<8x8x1xf32>
    %108 = vector.shape_cast %81 : vector<64x32xf32> to vector<8x8x32xf32>
    %109 = vector.broadcast %107 : vector<8x8x1xf32> to vector<8x8x32xf32>
    %110 = arith.mulf %109, %108 : vector<8x8x32xf32>
    %cst_41 = arith.constant dense<0.000000e+00> : vector<8x32xf32>
    %111 = vector.multi_reduction <add>, %110, %cst_41 [1] : vector<8x8x32xf32> to vector<8x32xf32>
    %c0_42 = arith.constant 0 : index
    %c0_43 = arith.constant 0 : index
    %112 = vector.load %arg10[%c0_42, %c0_43] : memref<8x32xf32, #tpu.memory_space<vmem>>, vector<8x32xf32>
    tpu.vector_store %arg10[%c0_42, %c0_43], %111 {strides = array<i32>} : memref<8x32xf32, #tpu.memory_space<vmem>>, vector<8x32xf32>,
    return
  }
  func.func @transform_0(%arg0: i32) -> (i32, i32) {
    %c0_i32 = arith.constant 0 : i32
    %c0_i32_0 = arith.constant 0 : i32
    return %arg0, %c0_i32 : i32, i32
  }
  func.func @transform_1(%arg0: i32) -> (i32, i32, i32) {
    %c0_i32 = arith.constant 0 : i32
    %c0_i32_0 = arith.constant 0 : i32
    %c0_i32_1 = arith.constant 0 : i32
    return %arg0, %c0_i32, %c0_i32_0 : i32, i32, i32
  }
  func.func @transform_2(%arg0: i32) -> (i32, i32) {
    %c0_i32 = arith.constant 0 : i32
    %c0_i32_0 = arith.constant 0 : i32
    %c0_i32_1 = arith.constant 0 : i32
    return %c0_i32, %c0_i32_0 : i32, i32
  }
  func.func @transform_3(%arg0: i32) -> (i32, i32) {
    %c0_i32 = arith.constant 0 : i32
    %c0_i32_0 = arith.constant 0 : i32
    %c0_i32_1 = arith.constant 0 : i32
    return %c0_i32, %c0_i32_0 : i32, i32
  }
  func.func @transform_4(%arg0: i32) -> (i32, i32) {
    %c0_i32 = arith.constant 0 : i32
    %c0_i32_0 = arith.constant 0 : i32
    %c0_i32_1 = arith.constant 0 : i32
    return %c0_i32, %c0_i32_0 : i32, i32
  }
  func.func @transform_5(%arg0: i32) -> (i32, i32) {
    %c0_i32 = arith.constant 0 : i32
    %c0_i32_0 = arith.constant 0 : i32
    %c0_i32_1 = arith.constant 0 : i32
    return %c0_i32, %c0_i32_0 : i32, i32
  }
  func.func @transform_6(%arg0: i32) -> (i32, i32) {
    %c0_i32 = arith.constant 0 : i32
    %c0_i32_0 = arith.constant 0 : i32
    %c0_i32_1 = arith.constant 0 : i32
    return %c0_i32, %c0_i32_0 : i32, i32
  }
  func.func @transform_7(%arg0: i32) -> (i32, i32) {
    %c0_i32 = arith.constant 0 : i32
    %c0_i32_0 = arith.constant 0 : i32
    %c0_i32_1 = arith.constant 0 : i32
    return %c0_i32, %c0_i32_0 : i32, i32
  }
  func.func @transform_8(%arg0: i32) -> (i32, i32) {
    %c0_i32 = arith.constant 0 : i32
    %c0_i32_0 = arith.constant 0 : i32
    %c0_i32_1 = arith.constant 0 : i32
    return %c0_i32, %c0_i32_0 : i32, i32
  }
  func.func @transform_9(%arg0: i32) -> (i32, i32) {
    %c0_i32 = arith.constant 0 : i32
    %c0_i32_0 = arith.constant 0 : i32
    return %arg0, %c0_i32 : i32, i32
  }
}

</mosaic_0001>

<bundles_post_ra>
// kernel: tpu_custom_call.1
= control target key start
LH: loop header
LB: loop body
LE: loop exit
PB: predicated region body
PF: predicated region fallthrough
CT: control target
= control target key end

     0   :  { %14 = vsyncpa [#allocation3], 0  ;;  %s4396_s0 = inlined_call_operand.vmem [shape: s32[8,1], index: 0, kind: input, shape index: {}]   ;;  %s4397_s1 = inlined_call_operand.vmem [shape: f32[8,8,32], index: 1, kind: input, shape index: {}]   ;;  %s4398_s2 = inlined_call_operand.hbm [shape: f32[32,96], index: 2, kind: input, shape index: {}]   ;;  %s4399_s3 = inlined_call_operand.vmem [shape: f32[1,96], index: 3, kind: input, shape index: {}]   ;;  %s4400_s4 = inlined_call_operand.hbm [shape: f32[32,32], index: 4, kind: input, shape index: {}]   ;;  %s4401_s5 = inlined_call_operand.vmem [shape: f32[1,32], index: 5, kind: input, shape index: {}]   ;;  %s4402_s6 = inlined_call_operand.hbm [shape: f32[32,64], index: 6, kind: input, shape index: {}]   ;;  %s4403_s7 = inlined_call_operand.vmem [shape: f32[1,64], index: 7, kind: input, shape index: {}]   ;;  %s4404_s8 = inlined_call_operand.vmem [shape: f32[64,1], index: 8, kind: input, shape index: {}]   ;;  %s4405_s9 = inlined_call_operand.hbm [shape: f32[8,32], index: 9, kind: output, shape index: {}]  }
   0x1   :  { %15 = vsyncpa [#allocation6], 0 }
   0x2   :  { %16 = vsyncpa [#allocation4], 0  ;;  %s40_s11 = sshll.u32 %s4400_s4, 4  ;;  %s3439_s12 = smov [#allocation5]   ;;  %s41_s11 = int_to_ptr.hbm [resolvable:$true] %s40_s11 }
   0x3   :  { %s42_s13 = sshll.u32 %s3439_s12, 4  ;;  %s25_s16 = sshll.u32 %s4398_s2, 4  ;;  %s43_s13 = int_to_ptr.vmem [resolvable:$true] %s42_s13  ;;  %s26_s16 = int_to_ptr.hbm [resolvable:$true] %s25_s16 }
   0x4   :  { %s3440_s17 = smov 128   ;;  %s3441_s18 = smov 8  }
   0x5   :  { %48 = dma.hbm_to_vmem [thread:$0]  %s41_s11, 512, %s43_s13, [#allocation6], %s3440_s17, %s3440_s17, %s3441_s18  }
   0x6   :  { %s3442_s19 = smov [#allocation2]   ;;  %s55_s23 = sshll.u32 %s4402_s6, 4  ;;  %s56_s23 = int_to_ptr.hbm [resolvable:$true] %s55_s23 }
   0x7   :  { %s27_s20 = sshll.u32 %s3442_s19, 4  ;;  %s3443_s4 = smov [#allocation7]   ;;  %s28_s20 = int_to_ptr.vmem [resolvable:$true] %s27_s20 }
   0x8   :  { %33 = dma.hbm_to_vmem [thread:$0]  %s26_s16, 512, %s28_s20, [#allocation3], %s3440_s17, %s3440_s17, %s3441_s18  }
   0x9   :  { %s57_s24 = sshll.u32 %s3443_s4, 4  ;;  %s58_s24 = int_to_ptr.vmem [resolvable:$true] %s57_s24 }
   0xa   :  { %63 = dma.hbm_to_vmem [thread:$0]  %s56_s23, 512, %s58_s24, [#allocation6], %s3440_s17, %s3440_s17, %s3441_s18  }
   0xb   :  { %3433 = dma.done.wait [#allocation3], 512  }
   0xc   :  { %3434 = vsyncadd [#allocation3], 4294966784 }
   0xd   :  { %3435 = dma.done.wait [#allocation6], 1024  }
   0xe   :  { %3436 = vsyncadd [#allocation6], 4294966272  ;;  %v91_v0 = vld [vmem:[#allocation2 + $0x18] sm:$0xff]  ;;  %v90_v1 = vld [vmem:[#allocation2 + $0x10] sm:$0xff]  ;;  %vm96_vm0 = vcmask 261120   ;;  %s3444_s21 = smov 96  }
   0xf   :  { %133 = vmatpush.msra.mxu0 %v91_v0  ;;  %v89_v2 = vld [vmem:[#allocation2 + $0x8] sm:$0xff]  ;;  %v88_v3 = vld [vmem:[#allocation2] sm:$0xff]  ;;  %v82_v6 = vld [vmem:[%s4397_s1 + $0x10] sm:$0xff]  ;;  %s3447_s22 = smov 88   ;;  %vm173_vm1 = vcmask 64512   ;;  %s3448_s23 = smov 56  }
  0x10   :  { %v80_v4 = vld [vmem:[%s4397_s1] sm:$0xff]  ;;  %v81_v5 = vld [vmem:[%s4397_s1 + $0x8] sm:$0xff]  ;;  %v83_v7 = vld [vmem:[%s4397_s1 + $0x18] sm:$0xff]  ;;  %s3449_s4 = smov 80   ;;  %s3450_s24 = smov 112   ;;  %vm2355_vm2 = vcmask 130048  }
  0x11   :  { %134 = vmatpush.msra.mxu0 %v90_v1  ;;  %v84_v8 = vld [vmem:[%s4397_s1 + $0x20] sm:$0xff]  ;;  %v85_v9 = vld [vmem:[%s4397_s1 + $0x28] sm:$0xff]  ;;  %v86_v10 = vld [vmem:[%s4397_s1 + $0x30] sm:$0xff]  ;;  %s3451_s2 = smov 48   ;;  %s3452_s6 = smov 72   ;;  %vm2364_vm3 = vcmask 195584  }
  0x12   :  { %v87_v11 = vld [vmem:[%s4397_s1 + $0x38] sm:$0xff]  ;;  %v3158_v12 = vld [vmem:[%s4399_s3] ss:$0 sm:$0xff]  ;;  %s3445_s1 = smov 120   ;;  %s3446_s3 = smov 64   ;;  %vm2535_vm4 = vcmask 523264  }
  0x13   :  { %135 = vmatpush.msra.mxu0 %v89_v2  ;;  %s3453_s25 = smov 104   ;;  %s3454_s26 = smov 40   ;;  %vm2635_vm6 = vcmask 7168   ;;  %vm2900_vm14 = vcmask 1041409   ;;  %vm2902_vm15 = vcmask 1042434  }
  0x14   :  { %s3455_s27 = smov 16   ;;  %s3456_s28 = smov 24  }
  0x15   :  { %136 = vmatpush.msra.mxu0 %v88_v3 }
  0x16   :  { %2934 = vmatmul.msk.f32.vlgmr.msra.gmra.mxu0 %vm96_vm0, %v80_v4 }
  0x1e   :  { %2935 = vmatmul.msk.f32.gmra.mxu0 %vm96_vm0, %v81_v5 }
  0x26   :  { %2936 = vmatmul.msk.f32.gmra.mxu0 %vm96_vm0, %v82_v6 }
  0x2e   :  { %2937 = vmatmul.msk.f32.gmra.mxu0 %vm96_vm0, %v83_v7 }
  0x36   :  { %2938 = vmatmul.msk.f32.gmra.mxu0 %vm96_vm0, %v84_v8 }
  0x3e   :  { %2939 = vmatmul.msk.f32.gmra.mxu0 %vm96_vm0, %v85_v9 }
  0x46   :  { %2940 = vmatmul.msk.f32.gmra.mxu0 %vm96_vm0, %v86_v10 }
  0x4e   :  { %2941 = vmatmul.msk.f32.gmra.mxu0 %vm96_vm0, %v87_v11 }
  0x93   :  { %v138_v13 = vpop.f32.mrf.mxu0 }
  0x94   :  { %v3556_v14 = vadd.f32 %v3158_v12, %v138_v13 }
  0x96   :  { %171 = vrot.lane.b32.xlu0 %v3556_v14, %s3444_s21  ;;  %v3614_v35 = vmul.f32 0.35355338, %v3556_v14 }
  0x9b   :  { %v141_v15 = vpop.f32.mrf.mxu0 }
  0x9c   :  { %v3559_v16 = vadd.f32 %v3158_v12, %v141_v15 }
  0x9e   :  { %200 = vrot.lane.b32.xlu0 %v3559_v16, %s3444_s21  ;;  %v3594_v32 = vpack.i.bf16 %v3559_v16, %v3556_v14  ;;  %v3604_v34 = vmul.f32 0.35355338, %v3559_v16 }
  0xa3   :  { %v144_v17 = vpop.f32.mrf.mxu0 }
  0xa4   :  { %v3562_v18 = vadd.f32 %v3158_v12, %v144_v17 }
  0xa6   :  { %228 = vrot.lane.b32.xlu1 %v3562_v18, %s3444_s21  ;;  %v3577_v27 = vmul.f32 0.35355338, %v3562_v18 }
  0xab   :  { %v147_v19 = vpop.f32.mrf.mxu0 }
  0xac   :  { %v3565_v20 = vadd.f32 %v3158_v12, %v147_v19 }
  0xae   :  { %256 = vrot.lane.b32.xlu1 %v3565_v20, %s3444_s21  ;;  %v3586_v30 = vpack.i.bf16 %v3565_v20, %v3562_v18  ;;  %v3638_v43 = vmul.f32 0.35355338, %v3565_v20 }
  0xb3   :  { %v150_v21 = vpop.f32.mrf.mxu0 }
  0xb4   :  { %v3568_v22 = vadd.f32 %v3158_v12, %v150_v21 }
  0xb6   :  { %284 = vrot.lane.b32.xlu2 %v3568_v22, %s3444_s21  ;;  %v3626_v39 = vmul.f32 0.35355338, %v3568_v22 }
  0xbb   :  { %v153_v23 = vpop.f32.mrf.mxu0 }
  0xbc   :  { %v3571_v24 = vadd.f32 %v3158_v12, %v153_v23 }
  0xbe   :  { %312 = vrot.lane.b32.xlu2 %v3571_v24, %s3444_s21  ;;  %v3601_v33 = vpack.i.bf16 %v3571_v24, %v3568_v22  ;;  %v3641_v44 = vmul.f32 0.35355338, %v3571_v24 }
  0xc3   :  { %v156_v25 = vpop.f32.mrf.mxu0 }
  0xc4   :  { %v3574_v26 = vadd.f32 %v3158_v12, %v156_v25 }
  0xc6   :  { %340 = vrot.lane.b32.xlu0 %v3574_v26, %s3444_s21  ;;  %747 = vrot.lane.b32.xlu2 %v3577_v27, %s3445_s1  ;;  %v3649_v46 = vmul.f32 0.35355338, %v3574_v26 }
  0xcb   :  { %v159_v28 = vpop.f32.mrf.mxu0 }
  0xcc   :  { %v3582_v29 = vadd.f32 %v3158_v12, %v159_v28 }
  0xce   :  { %368 = vrot.lane.b32.xlu1 %v3582_v29, %s3444_s21  ;;  %3096 = vrot.lane.b32.xlu0 %v3586_v30, %s3446_s3  ;;  %v3105_v31 = vpack.i.bf16 %v3582_v29, %v3574_v26  ;;  %v3655_v50 = vmul.f32 0.35355338, %v3582_v29 }
  0xd0   :  { %3106 = vrot.lane.b32.xlu2 %v3105_v31, %s3446_s3 }
  0xd6   :  { %3091 = vrot.lane.b32.xlu1 %v3594_v32, %s3446_s3  ;;  %721 = vrot.lane.b32.xlu0 %v3559_v16, %s3447_s22 }
  0xde   :  { %3101 = vrot.lane.b32.xlu1 %v3601_v33, %s3446_s3  ;;  %719 = vrot.lane.b32.xlu0 %v3604_v34, %s3445_s1 }
  0xe6   :  { %693 = vrot.lane.b32.xlu1 %v3556_v14, %s3447_s22  ;;  %777 = vrot.lane.b32.xlu0 %v3565_v20, %s3447_s22 }
  0xee   :  { %691 = vrot.lane.b32.xlu1 %v3614_v35, %s3445_s1 }
  0xf6   :  { %749 = vrot.lane.b32.xlu1 %v3562_v18, %s3447_s22 }
 0x108   :  { %v172_v36 = vpop.permute.xlu0 %171 }
 0x109   :  { %2942 = vmatpush.xpose.msk.msrb.mxu0 %vm173_vm1, %v172_v36 }
 0x10c   :  { %2943 = vmatmul.msk.f32.vlgmr.msrb.gmra.mxu0 %vm173_vm1, %v3614_v35 }
 0x110   :  { %v285_v37 = vpop.permute.xlu2 %284  ;;  %v201_v38 = vpop.permute.xlu0 %200 }
 0x111   :  { %2944 = vmatpush.xpose.msk.msra.mxu0 %vm173_vm1, %v201_v38  ;;  %2950 = vmatpush.xpose.msk.msra.mxu2 %vm173_vm1, %v285_v37 }
 0x114   :  { %2945 = vmatmul.msk.f32.vlgmr.msra.gmra.mxu0 %vm173_vm1, %v3604_v34  ;;  %2951 = vmatmul.msk.f32.vlgmr.msra.gmra.mxu2 %vm173_vm1, %v3626_v39 }
 0x118   :  { %v229_v40 = vpop.permute.xlu1 %228  ;;  %v313_v41 = vpop.permute.xlu2 %312 }
 0x119   :  { %2946 = vmatpush.xpose.msk.msra.mxu3 %vm173_vm1, %v229_v40 }
 0x11c   :  { %2947 = vmatmul.msk.f32.vlgmr.msra.gmra.mxu3 %vm173_vm1, %v3577_v27 }
 0x11d   :  { %2952 = vmatpush.xpose.msk.msrb.mxu3 %vm173_vm1, %v313_v41 }
 0x120   :  { %v257_v42 = vpop.permute.xlu1 %256  ;;  %v3678_v11 = vpop.permute.xlu2 %747 }
 0x121   :  { %2948 = vmatpush.xpose.msk.msrb.mxu0 %vm173_vm1, %v257_v42 }
 0x124   :  { %2949 = vmatmul.msk.f32.vlgmr.msrb.gmra.mxu0 %vm173_vm1, %v3638_v43  ;;  %2953 = vmatmul.msk.f32.vlgmr.msrb.gmra.mxu3 %vm173_vm1, %v3641_v44 }
 0x12a   :  { %v3682_v13 = vpop.permute.xlu2 %3106 }
 0x138   :  { %v341_v45 = vpop.permute.xlu0 %340 }
 0x139   :  { %2954 = vmatpush.xpose.msk.msra.mxu1 %vm173_vm1, %v341_v45 }
 0x13c   :  { %2955 = vmatmul.msk.f32.vlgmr.msra.gmra.mxu1 %vm173_vm1, %v3649_v46 }
 0x140   :  { %v369_v47 = vpop.permute.xlu1 %368  ;;  %v3097_v48 = vpop.permute.xlu0 %3096 }
 0x141   :  { %v3098_v49 = vunpack.i.l.bf16 %v3097_v48  ;;  %2956 = vmatpush.xpose.msk.msrb.mxu2 %vm173_vm1, %v369_v47  ;;  %v3099_v54 = vunpack.i.h.bf16 %v3097_v48 }
 0x144   :  { %2957 = vmatmul.msk.f32.vlgmr.msrb.gmra.mxu2 %vm173_vm1, %v3655_v50 }
 0x145   :  { %556 = vmatpush.msra.mxu2 %v3098_v49 }
 0x148   :  { %v3092_v51 = vpop.permute.xlu1 %3091  ;;  %v3676_v10 = vpop.permute.xlu0 %721 }
 0x149   :  { %v3093_v52 = vunpack.i.l.bf16 %v3092_v51  ;;  %v3094_v53 = vunpack.i.h.bf16 %v3092_v51 }
 0x14b   :  { %504 = vmatpush.msra.mxu3 %v3093_v52  ;;  %530 = vmatpush.msrb.mxu1 %v3094_v53 }
 0x14d   :  { %582 = vmatpush.msrb.mxu3 %v3099_v54 }
 0x150   :  { %v3102_v55 = vpop.permute.xlu1 %3101  ;;  %v3680_v12 = vpop.permute.xlu0 %719 }
 0x151   :  { %v3104_v56 = vunpack.i.h.bf16 %v3102_v55  ;;  %v3103_v57 = vunpack.i.l.bf16 %v3102_v55 }
 0x153   :  { %608 = vmatpush.msra.mxu1 %v3103_v57  ;;  %634 = vmatpush.msrb.mxu2 %v3104_v56 }
 0x158   :  { %v3684_v15 = vpop.permute.xlu1 %693  ;;  %v3686_v17 = vpop.permute.xlu0 %777 }
 0x160   :  { %v3688_v25 = vpop.permute.xlu1 %691 }
 0x168   :  { %v3694_v40 = vpop.permute.xlu1 %749 }
 0x189   :  { %v196_v58 = vpop.f32.mrf.mxu0 }
 0x18a   :  { %v395_v59 = vsel %vm173_vm1, %v196_v58, -inf }
 0x18b   :  { %396 = vmax.xlane.f32.xlu2 %v395_v59 }
 0x191   :  { %v224_v60 = vpop.f32.mrf.mxu0 }
 0x192   :  { %v398_v61 = vsel %vm173_vm1, %v224_v60, -inf }
 0x193   :  { %399 = vmax.xlane.f32.xlu0 %v398_v61 }
 0x197   :  { %v308_v2 = vpop.f32.mrf.mxu2 }
 0x198   :  { %v407_v5 = vsel %vm173_vm1, %v308_v2, -inf }
 0x19f   :  { %v252_v62 = vpop.f32.mrf.mxu3 }
 0x1a0   :  { %v401_v63 = vsel %vm173_vm1, %v252_v62, -inf }
 0x1a1   :  { %402 = vmax.xlane.f32.xlu1 %v401_v63  ;;  %v280_v0 = vpop.f32.mrf.mxu0 }
 0x1a2   :  { %v404_v1 = vsel %vm173_vm1, %v280_v0, -inf }
 0x1a3   :  { %405 = vmax.xlane.f32.xlu2 %v404_v1 }
 0x1a7   :  { %v336_v3 = vpop.f32.mrf.mxu3 }
 0x1a8   :  { %v410_v4 = vsel %vm173_vm1, %v336_v3, -inf }
 0x1a9   :  { %411 = vmax.xlane.f32.xlu0 %v410_v4 }
 0x1ab   :  { %408 = vmax.xlane.f32.xlu2 %v407_v5 }
 0x1b9   :  { %v364_v6 = vpop.f32.mrf.mxu1 }
 0x1ba   :  { %v413_v7 = vsel %vm173_vm1, %v364_v6, -inf }
 0x1bb   :  { %414 = vmax.xlane.f32.xlu1 %v413_v7 }
 0x1bd   :  { %833 = vrot.lane.b32.xlu0 %v3571_v24, %s3447_s22 }
 0x1c7   :  { %v3668_v8 = vpop.f32.mrf.mxu2 }
 0x1c8   :  { %v416_v9 = vsel %vm173_vm1, %v3668_v8, -inf }
 0x1c9   :  { %417 = vmax.xlane.f32.xlu2 %v416_v9 }
 0x1d4   :  { %775 = vrot.lane.b32.xlu1 %v3638_v43, %s3445_s1 }
 0x1e1   :  { %861 = vrot.lane.b32.xlu2 %v3574_v26, %s3447_s22 }
 0x1fe   :  { %v397_v19 = vpop.xlane.xlu2 %396 }
 0x1ff   :  { %v419_v21 = vsub.f32 %v196_v58, %v397_v19  ;;  %v3115_v19 = vpack.i.bf16 %v3556_v14, %v3571_v24 }
 0x201   :  { %v427_v23 = vmul.f32 1.442695, %v419_v21 }
 0x203   :  { %3161 = vpow2.f32 %v427_v23 }
 0x206   :  { %v400_v28 = vpop.xlane.xlu0 %399 }
 0x207   :  { %v420_v31 = vsub.f32 %v224_v60, %v400_v28 }
 0x209   :  { %v3690_v36 = vpop.eup %3161  ;;  %v429_v37 = vmul.f32 1.442695, %v420_v31 }
 0x20a   :  { %v443_v38 = vsel %vm173_vm1, %v3690_v36, 0.0 }
 0x20b   :  { %3163 = vpow2.f32 %v429_v37  ;;  %444 = vadd.xlane.f32.xlu0 %v443_v38  ;;  %v3120_v38 = vpack.i.bf16 %v3568_v22, %v3574_v26 }
 0x211   :  { %v3696_v41 = vpop.eup %3163 }
 0x212   :  { %v446_v42 = vsel %vm173_vm1, %v3696_v41, 0.0 }
 0x213   :  { %447 = vadd.xlane.f32.xlu1 %v446_v42 }
 0x214   :  { %v403_v45 = vpop.xlane.xlu1 %402 }
 0x215   :  { %v421_v47 = vsub.f32 %v252_v62, %v403_v45 }
 0x216   :  { %v406_v48 = vpop.xlane.xlu2 %405 }
 0x217   :  { %v431_v49 = vmul.f32 1.442695, %v421_v47  ;;  %v422_v51 = vsub.f32 %v280_v0, %v406_v48 }
 0x219   :  { %3165 = vpow2.f32 %v431_v49  ;;  %v433_v52 = vmul.f32 1.442695, %v422_v51  ;;  %v3108_v51 = vunpack.i.l.bf16 %v3682_v13 }
 0x21b   :  { %3167 = vpow2.f32 %v433_v52 }
 0x21c   :  { %v412_v53 = vpop.xlane.xlu0 %411 }
 0x21d   :  { %v424_v54 = vsub.f32 %v336_v3, %v412_v53 }
 0x21e   :  { %v409_v55 = vpop.xlane.xlu2 %408 }
 0x21f   :  { %v3700_v56 = vpop.eup %3165  ;;  %v437_v57 = vmul.f32 1.442695, %v424_v54  ;;  %v423_v58 = vsub.f32 %v308_v2, %v409_v55  ;;  %v3109_v55 = vunpack.i.h.bf16 %v3682_v13 }
 0x220   :  { %v449_v59 = vsel %vm173_vm1, %v3700_v56, 0.0 }
 0x221   :  { %v3704_v60 = vpop.eup %3167  ;;  %3169 = vpow2.f32 %v437_v57  ;;  %v435_v61 = vmul.f32 1.442695, %v423_v58  ;;  %450 = vadd.xlane.f32.xlu2 %v449_v59 }
 0x222   :  { %v452_v62 = vsel %vm173_vm1, %v3704_v60, 0.0 }
 0x223   :  { %3171 = vpow2.f32 %v435_v61  ;;  %453 = vadd.xlane.f32.xlu0 %v452_v62 }
 0x227   :  { %v3708_v63 = vpop.eup %3169 }
 0x228   :  { %v458_v1 = vsel %vm173_vm1, %v3708_v63, 0.0 }
 0x229   :  { %v3710_v0 = vpop.eup %3171 }
 0x22a   :  { %v455_v2 = vsel %vm173_vm1, %v3710_v0, 0.0 }
 0x22b   :  { %459 = vadd.xlane.f32.xlu0 %v458_v1  ;;  %456 = vadd.xlane.f32.xlu2 %v455_v2 }
 0x22c   :  { %831 = vrot.lane.b32.xlu1 %v3641_v44, %s3445_s1 }
 0x22e   :  { %v415_v3 = vpop.xlane.xlu1 %414 }
 0x22f   :  { %v425_v4 = vsub.f32 %v364_v6, %v415_v3  ;;  %v3749_v37 = vpop.permute.xlu0 %833 }
 0x231   :  { %v439_v5 = vmul.f32 1.442695, %v425_v4 }
 0x233   :  { %3173 = vpow2.f32 %v439_v5 }
 0x234   :  { %803 = vrot.lane.b32.xlu1 %v3626_v39, %s3445_s1 }
 0x239   :  { %v3720_v7 = vpop.eup %3173 }
 0x23a   :  { %v461_v9 = vsel %vm173_vm1, %v3720_v7, 0.0 }
 0x23b   :  { %462 = vadd.xlane.f32.xlu2 %v461_v9 }
 0x23c   :  { %3116 = vrot.lane.b32.xlu1 %v3115_v19, %s3448_s23  ;;  %v418_v21 = vpop.xlane.xlu2 %417 }
 0x23d   :  { %v426_v6 = vsub.f32 %v3668_v8, %v418_v21  ;;  %v3110_v8 = vpack.i.bf16 %v3562_v18, %v3559_v16 }
 0x23f   :  { %v441_v23 = vmul.f32 1.442695, %v426_v6  ;;  %805 = vrot.lane.b32.xlu0 %v3568_v22, %s3447_s22 }
 0x241   :  { %3175 = vpow2.f32 %v441_v23 }
 0x244   :  { %v862_v52 = vpop.permute.xlu2 %861 }
 0x246   :  { %v776_v42 = vpop.permute.xlu1 %775 }
 0x247   :  { %v3730_v28 = vpop.eup %3175  ;;  %889 = vrot.lane.b32.xlu0 %v3582_v29, %s3447_s22 }
 0x248   :  { %v464_v31 = vsel %vm173_vm1, %v3730_v28, 0.0 }
 0x249   :  { %465 = vadd.xlane.f32.xlu2 %v464_v31 }
 0x24f   :  { %1241 = vrot.lane.b32.xlu0 %v3559_v16, %s3449_s4 }
 0x257   :  { %1213 = vrot.lane.b32.xlu0 %v3556_v14, %s3449_s4 }
 0x25f   :  { %1351 = vrot.lane.b32.xlu0 %v3641_v44, %s3450_s24 }
 0x261   :  { %859 = vrot.lane.b32.xlu2 %v3649_v46, %s3445_s1 }
 0x269   :  { %887 = vrot.lane.b32.xlu2 %v3655_v50, %s3445_s1 }
 0x271   :  { %3111 = vrot.lane.b32.xlu2 %v3110_v8, %s3448_s23 }
 0x279   :  { %3121 = vrot.lane.b32.xlu2 %v3120_v38, %s3448_s23 }
 0x27e   :  { %v445_v45 = vpop.xlane.xlu0 %444 }
 0x27f   :  { %3177 = vrcp.f32 %v445_v45 }
 0x281   :  { %1239 = vrot.lane.b32.xlu2 %v3604_v34, %s3450_s24 }
 0x285   :  { %v3178_v47 = vpop.eup %3177 }
 0x286   :  { %v475_v48 = vmul.f32 %v3178_v47, %v3690_v36  ;;  %v448_v49 = vpop.xlane.xlu1 %447 }
 0x287   :  { %3179 = vrcp.f32 %v448_v49 }
 0x288   :  { %2958 = vmatmul.msk.f32.vlgmr.msra.gmra.mxu3 %vm173_vm1, %v475_v48 }
 0x289   :  { %660 = vmatpush.msra.mxu3 %v3108_v51  ;;  %1353 = vrot.lane.b32.xlu2 %v3571_v24, %s3449_s4 }
 0x28d   :  { %v3180_v53 = vpop.eup %3179 }
 0x28e   :  { %v476_v54 = vmul.f32 %v3180_v53, %v3696_v41 }
 0x290   :  { %2959 = vmatmul.msk.f32.vlgmr.msrb.gmra.mxu1 %vm173_vm1, %v476_v54 }
 0x291   :  { %686 = vmatpush.msrb.mxu1 %v3109_v55  ;;  %1267 = vrot.lane.b32.xlu2 %v3577_v27, %s3450_s24 }
 0x294   :  { %v451_v36 = vpop.xlane.xlu2 %450 }
 0x295   :  { %3181 = vrcp.f32 %v451_v36 }
 0x296   :  { %v454_v57 = vpop.xlane.xlu0 %453 }
 0x297   :  { %3183 = vrcp.f32 %v454_v57 }
 0x29b   :  { %v3182_v58 = vpop.eup %3181 }
 0x29c   :  { %v477_v59 = vmul.f32 %v3182_v58, %v3700_v56 }
 0x29d   :  { %v3184_v61 = vpop.eup %3183 }
 0x29e   :  { %v478_v62 = vmul.f32 %v3184_v61, %v3704_v60  ;;  %v460_v1 = vpop.xlane.xlu0 %459  ;;  %2960 = vmatmul.msk.f32.vlgmr.msra.gmra.mxu2 %vm173_vm1, %v477_v59  ;;  %v457_v13 = vpop.xlane.xlu2 %456 }
 0x29f   :  { %3185 = vrcp.f32 %v460_v1  ;;  %2966 = vmatpush.xpose.msk.msra.mxu2 %vm173_vm1, %v3684_v15 }
 0x2a0   :  { %3187 = vrcp.f32 %v457_v13  ;;  %2961 = vmatmul.msk.f32.vlgmr.msrb.gmra.mxu3 %vm173_vm1, %v478_v62 }
 0x2a1   :  { %2968 = vmatpush.xpose.msk.msrb.mxu3 %vm173_vm1, %v3676_v10 }
 0x2a5   :  { %v3186_v41 = vpop.eup %3185 }
 0x2a6   :  { %v3188_v2 = vpop.eup %3187  ;;  %v480_v56 = vmul.f32 %v3186_v41, %v3708_v63  ;;  %v832_v63 = vpop.permute.xlu1 %831 }
 0x2a7   :  { %v479_v60 = vmul.f32 %v3188_v2, %v3710_v0 }
 0x2a8   :  { %2963 = vmatmul.msk.f32.vlgmr.msrb.gmra.mxu2 %vm173_vm1, %v480_v56 }
 0x2a9   :  { %2962 = vmatmul.msk.f32.vlgmr.msra.gmra.mxu1 %vm173_vm1, %v479_v60  ;;  %2972 = vmatpush.xpose.msk.msrb.mxu2 %vm173_vm1, %v3686_v17 }
 0x2aa   :  { %2970 = vmatpush.xpose.msk.msra.mxu1 %vm173_vm1, %v3694_v40 }
 0x2ae   :  { %v463_v15 = vpop.xlane.xlu2 %462  ;;  %v804_v40 = vpop.permute.xlu1 %803 }
 0x2af   :  { %3189 = vrcp.f32 %v463_v15 }
 0x2b0   :  { %2967 = vmatmul.msk.f32.vlgmr.msra.gmra.mxu2 %vm173_vm1, %v3688_v25 }
 0x2b1   :  { %2978 = vmatpush.xpose.msk.msra.mxu2 %vm173_vm1, %v862_v52  ;;  %v806_v3 = vpop.permute.xlu0 %805 }
 0x2b5   :  { %v3190_v10 = vpop.eup %3189 }
 0x2b6   :  { %v481_v0 = vmul.f32 %v3190_v10, %v3720_v7  ;;  %v3117_v9 = vpop.permute.xlu1 %3116 }
 0x2b7   :  { %v3119_v21 = vunpack.i.h.bf16 %v3117_v9 }
 0x2b8   :  { %2964 = vmatmul.msk.f32.vlgmr.msra.gmra.mxu3 %vm173_vm1, %v481_v0  ;;  %2973 = vmatmul.msk.f32.vlgmr.msrb.gmra.mxu2 %vm173_vm1, %v776_v42 }
 0x2b9   :  { %2974 = vmatpush.xpose.msk.msra.mxu3 %vm173_vm1, %v806_v3  ;;  %v890_v4 = vpop.permute.xlu0 %889 }
 0x2bc   :  { %v466_v17 = vpop.xlane.xlu2 %465 }
 0x2bd   :  { %3191 = vrcp.f32 %v466_v17 }
 0x2c0   :  { %2969 = vmatmul.msk.f32.vlgmr.msrb.gmra.mxu3 %vm173_vm1, %v3680_v12 }
 0x2c1   :  { %2980 = vmatpush.xpose.msk.msrb.mxu3 %vm173_vm1, %v890_v4  ;;  %v3839_v15 = vpop.permute.xlu0 %1241 }
 0x2c3   :  { %v3192_v25 = vpop.eup %3191 }
 0x2c4   :  { %v482_v5 = vmul.f32 %v3192_v25, %v3730_v28  ;;  %v860_v7 = vpop.permute.xlu2 %859  ;;  %v3118_v28 = vunpack.i.l.bf16 %v3117_v9 }
 0x2c5   :  { %2979 = vmatmul.msk.f32.vlgmr.msra.gmra.mxu2 %vm173_vm1, %v860_v7 }
 0x2c6   :  { %2965 = vmatmul.msk.f32.vlgmr.msrb.gmra.mxu1 %vm173_vm1, %v482_v5 }
 0x2c7   :  { %2976 = vmatpush.xpose.msk.msrb.mxu1 %vm173_vm1, %v3749_v37 }
 0x2c8   :  { %2975 = vmatmul.msk.f32.vlgmr.msra.gmra.mxu3 %vm173_vm1, %v804_v40 }
 0x2c9   :  { %v3843_v17 = vpop.permute.xlu0 %1213 }
 0x2cc   :  { %v888_v19 = vpop.permute.xlu2 %887 }
 0x2ce   :  { %2971 = vmatmul.msk.f32.vlgmr.msra.gmra.mxu1 %vm173_vm1, %v3678_v11 }
 0x2cf   :  { %1024 = vmatpush.msra.mxu1 %v3119_v21 }
 0x2d0   :  { %2981 = vmatmul.msk.f32.vlgmr.msrb.gmra.mxu3 %vm173_vm1, %v888_v19 }
 0x2d1   :  { %v3851_v5 = vpop.permute.xlu0 %1351 }
 0x2d4   :  { %v3112_v12 = vpop.permute.xlu2 %3111 }
 0x2d5   :  { %v3114_v6 = vunpack.i.h.bf16 %v3112_v12  ;;  %v3113_v23 = vunpack.i.l.bf16 %v3112_v12 }
 0x2d6   :  { %2977 = vmatmul.msk.f32.vlgmr.msrb.gmra.mxu1 %vm173_vm1, %v832_v63 }
 0x2d7   :  { %1050 = vmatpush.msrb.mxu2 %v3113_v23  ;;  %1076 = vmatpush.msra.mxu3 %v3114_v6 }
 0x2d9   :  { %1154 = vmatpush.msra.mxu2 %v3118_v28 }
 0x2dc   :  { %v3122_v31 = vpop.permute.xlu2 %3121 }
 0x2dd   :  { %v3124_v8 = vunpack.i.h.bf16 %v3122_v31  ;;  %v3123_v37 = vunpack.i.l.bf16 %v3122_v31 }
 0x2df   :  { %1128 = vmatpush.msrb.mxu1 %v3124_v8  ;;  %1180 = vmatpush.msrb.mxu3 %v3123_v37 }
 0x2e4   :  { %v3841_v10 = vpop.permute.xlu2 %1239 }
 0x2ec   :  { %v3845_v40 = vpop.permute.xlu2 %1353 }
 0x2f4   :  { %v3853_v7 = vpop.permute.xlu2 %1267 }
 0x30b   :  { %v3804_v11 = vpop.f32.mrf.mxu3 }
 0x30d   :  { %v3808_v45 = vpop.f32.mrf.mxu1 }
 0x321   :  { %v3802_v38 = vpop.f32.mrf.mxu2 }
 0x323   :  { %v3810_v47 = vpop.f32.mrf.mxu3 }
 0x326   :  { %v3813_v51 = vpop.f32.mrf.mxu1 }
 0x32b   :  { %v3806_v42 = vpop.f32.mrf.mxu2 }
 0x333   :  { %v716_v48 = vpop.f32.mrf.mxu2 }
 0x334   :  { %v915_v49 = vsel %vm173_vm1, %v716_v48, -inf }
 0x335   :  { %916 = vmax.xlane.f32.xlu1 %v915_v49 }
 0x33b   :  { %v3815_v52 = vpop.f32.mrf.mxu3  ;;  %v3820_v36 = vpop.f32.mrf.mxu2 }
 0x33c   :  { %v924_v60 = vsel %vm173_vm1, %v3820_v36, -inf }
 0x343   :  { %v3817_v53 = vpop.f32.mrf.mxu1  ;;  %v744_v54 = vpop.f32.mrf.mxu3 }
 0x344   :  { %v918_v55 = vsel %vm173_vm1, %v744_v54, -inf }
 0x345   :  { %919 = vmax.xlane.f32.xlu1 %v918_v55 }
 0x348   :  { %v884_v62 = vpop.f32.mrf.mxu2 }
 0x349   :  { %v933_v41 = vsel %vm173_vm1, %v884_v62, -inf }
 0x34b   :  { %v3822_v57 = vpop.f32.mrf.mxu1  ;;  %v828_v58 = vpop.f32.mrf.mxu3 }
 0x34c   :  { %v927_v59 = vsel %vm173_vm1, %v828_v58, -inf  ;;  %v921_v61 = vsel %vm173_vm1, %v3822_v57, -inf }
 0x34d   :  { %928 = vmax.xlane.f32.xlu2 %v927_v59  ;;  %922 = vmax.xlane.f32.xlu0 %v921_v61 }
 0x353   :  { %v856_v1 = vpop.f32.mrf.mxu1  ;;  %v3829_v2 = vpop.f32.mrf.mxu3 }
 0x354   :  { %v930_v13 = vsel %vm173_vm1, %v856_v1, -inf  ;;  %v936_v56 = vsel %vm173_vm1, %v3829_v2, -inf }
 0x355   :  { %931 = vmax.xlane.f32.xlu2 %v930_v13  ;;  %934 = vmax.xlane.f32.xlu0 %v933_v41 }
 0x35d   :  { %937 = vmax.xlane.f32.xlu0 %v936_v56 }
 0x35e   :  { %1269 = vrot.lane.b32.xlu1 %v3562_v18, %s3449_s4 }
 0x36d   :  { %1211 = vrot.lane.b32.xlu2 %v3614_v35, %s3450_s24 }
 0x388   :  { %925 = vmax.xlane.f32.xlu1 %v924_v60 }
 0x3a8   :  { %v917_v63 = vpop.xlane.xlu1 %916 }
 0x3a9   :  { %v939_v0 = vsub.f32 %v716_v48, %v917_v63 }
 0x3ab   :  { %v947_v3 = vmul.f32 1.442695, %v939_v0 }
 0x3ad   :  { %3193 = vpow2.f32 %v947_v3 }
 0x3b3   :  { %v3847_v4 = vpop.eup %3193 }
 0x3b4   :  { %v963_v25 = vsel %vm173_vm1, %v3847_v4, 0.0 }
 0x3b5   :  { %964 = vadd.xlane.f32.xlu1 %v963_v25 }
 0x3b8   :  { %v920_v9 = vpop.xlane.xlu1 %919 }
 0x3b9   :  { %v940_v19 = vsub.f32 %v744_v54, %v920_v9 }
 0x3bb   :  { %v949_v21 = vmul.f32 1.442695, %v940_v19 }
 0x3bd   :  { %3195 = vpow2.f32 %v949_v21 }
 0x3c0   :  { %v923_v12 = vpop.xlane.xlu0 %922  ;;  %v929_v6 = vpop.xlane.xlu2 %928 }
 0x3c1   :  { %v943_v23 = vsub.f32 %v828_v58, %v929_v6  ;;  %v941_v0 = vsub.f32 %v3822_v57, %v923_v12  ;;  %v3130_v6 = vpack.i.bf16 %v3571_v24, %v3562_v18 }
 0x3c3   :  { %v3855_v28 = vpop.eup %3195  ;;  %v955_v31 = vmul.f32 1.442695, %v943_v23  ;;  %v951_v25 = vmul.f32 1.442695, %v941_v0 }
 0x3c4   :  { %v966_v8 = vsel %vm173_vm1, %v3855_v28, 0.0 }
 0x3c5   :  { %967 = vadd.xlane.f32.xlu2 %v966_v8  ;;  %3197 = vpow2.f32 %v955_v31 }
 0x3c8   :  { %v935_v37 = vpop.xlane.xlu0 %934  ;;  %v932_v49 = vpop.xlane.xlu2 %931 }
 0x3c9   :  { %v945_v48 = vsub.f32 %v884_v62, %v935_v37  ;;  %v944_v54 = vsub.f32 %v856_v1, %v932_v49 }
 0x3cb   :  { %v959_v55 = vmul.f32 1.442695, %v945_v48  ;;  %v3859_v59 = vpop.eup %3197  ;;  %v957_v58 = vmul.f32 1.442695, %v944_v54  ;;  %v3125_v54 = vpack.i.bf16 %v3556_v14, %v3559_v16 }
 0x3cc   :  { %v975_v61 = vsel %vm173_vm1, %v3859_v59, 0.0 }
 0x3cd   :  { %3199 = vpow2.f32 %v959_v55  ;;  %976 = vadd.xlane.f32.xlu0 %v975_v61  ;;  %v3135_v55 = vpack.i.bf16 %v3574_v26, %v3568_v22 }
 0x3ce   :  { %3201 = vpow2.f32 %v957_v58 }
 0x3d0   :  { %v3879_v1 = vpop.permute.xlu1 %1269  ;;  %v938_v19 = vpop.xlane.xlu0 %937 }
 0x3d1   :  { %v1212_v48 = vpop.permute.xlu2 %1211 }
 0x3d3   :  { %v3863_v13 = vpop.eup %3199 }
 0x3d4   :  { %v981_v41 = vsel %vm173_vm1, %v3863_v13, 0.0  ;;  %v3867_v56 = vpop.eup %3201 }
 0x3d5   :  { %982 = vadd.xlane.f32.xlu0 %v981_v41  ;;  %v978_v62 = vsel %vm173_vm1, %v3867_v56, 0.0 }
 0x3dd   :  { %1325 = vrot.lane.b32.xlu2 %v3568_v22, %s3449_s4  ;;  %979 = vadd.xlane.f32.xlu0 %v978_v62 }
 0x3e5   :  { %1379 = vrot.lane.b32.xlu2 %v3649_v46, %s3450_s24 }
 0x3ed   :  { %1081 = vrot.lane.b32.xlu2 %v3565_v20, %s3448_s23 }
 0x3f1   :  { %1381 = vrot.lane.b32.xlu0 %v3574_v26, %s3449_s4 }
 0x3f5   :  { %1185 = vrot.lane.b32.xlu2 %v3582_v29, %s3448_s23 }
 0x3fb   :  { %v926_v60 = vpop.xlane.xlu1 %925 }
 0x3fc   :  { %v942_v63 = vsub.f32 %v3820_v36, %v926_v60  ;;  %v946_v36 = vsub.f32 %v3829_v2, %v938_v19 }
 0x3fd   :  { %1297 = vrot.lane.b32.xlu2 %v3565_v20, %s3449_s4 }
 0x3fe   :  { %v953_v3 = vmul.f32 1.442695, %v942_v63  ;;  %v961_v12 = vmul.f32 1.442695, %v946_v36 }
 0x400   :  { %3203 = vpow2.f32 %v953_v3 }
 0x401   :  { %3205 = vpow2.f32 %v951_v25 }
 0x402   :  { %3207 = vpow2.f32 %v961_v12 }
 0x405   :  { %1295 = vrot.lane.b32.xlu2 %v3638_v43, %s3450_s24 }
 0x406   :  { %v3889_v9 = vpop.eup %3203 }
 0x407   :  { %v972_v21 = vsel %vm173_vm1, %v3889_v9, 0.0  ;;  %v3896_v57 = vpop.eup %3205 }
 0x408   :  { %973 = vadd.xlane.f32.xlu1 %v972_v21  ;;  %v969_v23 = vsel %vm173_vm1, %v3896_v57, 0.0  ;;  %v3903_v31 = vpop.eup %3207 }
 0x409   :  { %v984_v2 = vsel %vm173_vm1, %v3903_v31, 0.0 }
 0x40d   :  { %3131 = vrot.lane.b32.xlu2 %v3130_v6, %s3451_s2 }
 0x410   :  { %970 = vadd.xlane.f32.xlu1 %v969_v23 }
 0x415   :  { %1733 = vrot.lane.b32.xlu2 %v3556_v14, %s3452_s6 }
 0x41b   :  { %985 = vadd.xlane.f32.xlu0 %v984_v2 }
 0x428   :  { %v965_v8 = vpop.xlane.xlu1 %964 }
 0x429   :  { %3209 = vrcp.f32 %v965_v8  ;;  %1323 = vrot.lane.b32.xlu1 %v3626_v39, %s3450_s24 }
 0x42f   :  { %v3210_v37 = vpop.eup %3209  ;;  %1409 = vrot.lane.b32.xlu0 %v3582_v29, %s3449_s4 }
 0x430   :  { %v995_v49 = vmul.f32 %v3210_v37, %v3847_v4 }
 0x431   :  { %1407 = vrot.lane.b32.xlu1 %v3655_v50, %s3450_s24 }
 0x432   :  { %2982 = vmatmul.msk.f32.vlgmr.msra.gmra.mxu1 %vm173_vm1, %v995_v49 }
 0x433   :  { %2990 = vmatpush.xpose.msk.msra.mxu1 %vm173_vm1, %v3843_v17 }
 0x437   :  { %3136 = vrot.lane.b32.xlu0 %v3135_v55, %s3451_s2 }
 0x438   :  { %v968_v4 = vpop.xlane.xlu2 %967 }
 0x439   :  { %3211 = vrcp.f32 %v968_v4  ;;  %3126 = vrot.lane.b32.xlu1 %v3125_v54, %s3451_s2 }
 0x43f   :  { %v3212_v61 = vpop.eup %3211  ;;  %1759 = vrot.lane.b32.xlu0 %v3604_v34, %s3453_s25 }
 0x440   :  { %v996_v58 = vmul.f32 %v3212_v61, %v3855_v28  ;;  %v1326_v17 = vpop.permute.xlu2 %1325  ;;  %v977_v41 = vpop.xlane.xlu0 %976 }
 0x441   :  { %3213 = vrcp.f32 %v977_v41 }
 0x442   :  { %2983 = vmatmul.msk.f32.vlgmr.msrb.gmra.mxu2 %vm173_vm1, %v996_v58 }
 0x443   :  { %2992 = vmatpush.xpose.msk.msrb.mxu2 %vm173_vm1, %v3839_v15 }
 0x447   :  { %v3214_v14 = vpop.eup %3213  ;;  %1731 = vrot.lane.b32.xlu0 %v3614_v35, %s3453_s25 }
 0x448   :  { %v1380_v62 = vpop.permute.xlu2 %1379  ;;  %v999_v60 = vmul.f32 %v3214_v14, %v3859_v59  ;;  %v983_v28 = vpop.xlane.xlu0 %982 }
 0x44a   :  { %2986 = vmatmul.msk.f32.vlgmr.msrb.gmra.mxu1 %vm173_vm1, %v999_v60 }
 0x44b   :  { %2998 = vmatpush.xpose.msk.msrb.mxu1 %vm173_vm1, %v1326_v17 }
 0x450   :  { %v1082_v34 = vpop.permute.xlu2 %1081  ;;  %v980_v63 = vpop.xlane.xlu0 %979 }
 0x451   :  { %1102 = vmatpush.msra.mxu0 %v1082_v34  ;;  %3215 = vrcp.f32 %v980_v63 }
 0x452   :  { %2991 = vmatmul.msk.f32.vlgmr.msra.gmra.mxu1 %vm173_vm1, %v1212_v48 }
 0x457   :  { %v3216_v0 = vpop.eup %3215 }
 0x458   :  { %v1186_v15 = vpop.permute.xlu2 %1185  ;;  %v1000_v3 = vmul.f32 %v3216_v0, %v3867_v56 }
 0x459   :  { %1206 = vmatpush.msrb.mxu0 %v1186_v15 }
 0x45a   :  { %2987 = vmatmul.msk.f32.vlgmr.msra.gmra.mxu2 %vm173_vm1, %v1000_v3 }
 0x45b   :  { %3000 = vmatpush.xpose.msk.msra.mxu2 %vm173_vm1, %v3845_v40 }
 0x460   :  { %v1298_v56 = vpop.permute.xlu2 %1297 }
 0x462   :  { %2993 = vmatmul.msk.f32.vlgmr.msrb.gmra.mxu2 %vm173_vm1, %v3841_v10 }
 0x463   :  { %v1382_v21 = vpop.permute.xlu0 %1381 }
 0x46a   :  { %3001 = vmatmul.msk.f32.vlgmr.msra.gmra.mxu2 %vm173_vm1, %v3851_v5  ;;  %v1296_v5 = vpop.permute.xlu2 %1295 }
 0x472   :  { %v3132_v2 = vpop.permute.xlu2 %3131 }
 0x473   :  { %v3133_v8 = vunpack.i.l.bf16 %v3132_v2  ;;  %v3134_v54 = vunpack.i.h.bf16 %v3132_v2 }
 0x47b   :  { %v974_v35 = vpop.xlane.xlu1 %973 }
 0x47c   :  { %3217 = vrcp.f32 %v974_v35 }
 0x482   :  { %v3218_v59 = vpop.eup %3217 }
 0x483   :  { %v998_v25 = vmul.f32 %v3218_v59, %v3889_v9  ;;  %v971_v19 = vpop.xlane.xlu1 %970 }
 0x484   :  { %3219 = vrcp.f32 %v971_v19 }
 0x485   :  { %2985 = vmatmul.msk.f32.vlgmr.msra.gmra.mxu0 %vm173_vm1, %v998_v25  ;;  %3221 = vrcp.f32 %v983_v28 }
 0x486   :  { %2996 = vmatpush.xpose.msk.msra.mxu0 %vm173_vm1, %v1298_v56 }
 0x48a   :  { %v3220_v40 = vpop.eup %3219 }
 0x48b   :  { %v997_v10 = vmul.f32 %v3220_v40, %v3896_v57  ;;  %v3222_v9 = vpop.eup %3221 }
 0x48c   :  { %v1001_v6 = vmul.f32 %v3222_v9, %v3863_v13 }
 0x48d   :  { %2984 = vmatmul.msk.f32.vlgmr.msra.gmra.mxu3 %vm173_vm1, %v997_v10 }
 0x48e   :  { %2994 = vmatpush.xpose.msk.msra.mxu3 %vm173_vm1, %v3879_v1  ;;  %v986_v36 = vpop.xlane.xlu0 %985 }
 0x48f   :  { %3223 = vrcp.f32 %v986_v36 }
 0x495   :  { %2988 = vmatmul.msk.f32.vlgmr.msrb.gmra.mxu3 %vm173_vm1, %v1001_v6  ;;  %v3224_v12 = vpop.eup %3223  ;;  %v3991_v6 = vpop.permute.xlu2 %1733 }
 0x496   :  { %3002 = vmatpush.xpose.msk.msrb.mxu3 %vm173_vm1, %v1382_v21  ;;  %v1002_v23 = vmul.f32 %v3224_v12, %v3903_v31 }
 0x498   :  { %2989 = vmatmul.msk.f32.vlgmr.msrb.gmra.mxu0 %vm173_vm1, %v1002_v23 }
 0x49b   :  { %v1324_v57 = vpop.permute.xlu1 %1323 }
 0x49c   :  { %2999 = vmatmul.msk.f32.vlgmr.msrb.gmra.mxu1 %vm173_vm1, %v1324_v57 }
 0x49d   :  { %2995 = vmatmul.msk.f32.vlgmr.msra.gmra.mxu3 %vm173_vm1, %v3853_v7 }
 0x49e   :  { %1596 = vmatpush.msra.mxu3 %v3133_v8 }
 0x4a0   :  { %2997 = vmatmul.msk.f32.vlgmr.msra.gmra.mxu0 %vm173_vm1, %v1296_v5 }
 0x4a1   :  { %v1410_v13 = vpop.permute.xlu0 %1409 }
 0x4a2   :  { %3004 = vmatpush.xpose.msk.msrb.mxu0 %vm173_vm1, %v1410_v13 }
 0x4a3   :  { %v1408_v1 = vpop.permute.xlu1 %1407 }
 0x4a5   :  { %3003 = vmatmul.msk.f32.vlgmr.msrb.gmra.mxu3 %vm173_vm1, %v1380_v62 }
 0x4a8   :  { %3005 = vmatmul.msk.f32.vlgmr.msrb.gmra.mxu0 %vm173_vm1, %v1408_v1 }
 0x4a9   :  { %v3137_v31 = vpop.permute.xlu0 %3136 }
 0x4aa   :  { %v3139_v37 = vunpack.i.h.bf16 %v3137_v31  ;;  %v3138_v4 = vunpack.i.l.bf16 %v3137_v31 }
 0x4ab   :  { %v3127_v48 = vpop.permute.xlu1 %3126 }
 0x4ac   :  { %v3129_v49 = vunpack.i.h.bf16 %v3127_v48  ;;  %v3128_v55 = vunpack.i.l.bf16 %v3127_v48  ;;  %1700 = vmatpush.msrb.mxu3 %v3139_v37 }
 0x4ae   :  { %1544 = vmatpush.msra.mxu1 %v3129_v49  ;;  %1570 = vmatpush.msrb.mxu2 %v3128_v55 }
 0x4af   :  { %v3962_v7 = vpop.f32.mrf.mxu1 }
 0x4b0   :  { %1648 = vmatpush.msrb.mxu1 %v3138_v4  ;;  %1674 = vmatpush.msra.mxu2 %v3134_v54 }
 0x4b1   :  { %v4003_v37 = vpop.permute.xlu0 %1759 }
 0x4b9   :  { %v4009_v48 = vpop.permute.xlu0 %1731 }
 0x4c5   :  { %v3967_v41 = vpop.f32.mrf.mxu2 }
 0x4c7   :  { %v3964_v61 = vpop.f32.mrf.mxu1 }
 0x4cf   :  { %v1236_v58 = vpop.f32.mrf.mxu1 }
 0x4d0   :  { %v1435_v17 = vsel %vm173_vm1, %v1236_v58, -inf }
 0x4d1   :  { %1436 = vmax.xlane.f32.xlu1 %v1435_v17 }
 0x4dd   :  { %v3969_v14 = vpop.f32.mrf.mxu2 }
 0x4e5   :  { %v1264_v62 = vpop.f32.mrf.mxu2 }
 0x4e6   :  { %v1438_v60 = vsel %vm173_vm1, %v1264_v62, -inf }
 0x4e7   :  { %1439 = vmax.xlane.f32.xlu2 %v1438_v60 }
 0x4ed   :  { %v1376_v40 = vpop.f32.mrf.mxu2 }
 0x4ee   :  { %v1450_v10 = vsel %vm173_vm1, %v1376_v40, -inf }
 0x502   :  { %v3972_v28 = vpop.f32.mrf.mxu0 }
 0x510   :  { %v3974_v34 = vpop.f32.mrf.mxu3 }
 0x515   :  { %v3976_v63 = vpop.f32.mrf.mxu0 }
 0x518   :  { %v3978_v0 = vpop.f32.mrf.mxu3 }
 0x519   :  { %v1348_v15 = vpop.f32.mrf.mxu1 }
 0x51a   :  { %v1447_v3 = vsel %vm173_vm1, %v1348_v15, -inf }
 0x51b   :  { %1448 = vmax.xlane.f32.xlu1 %v1447_v3 }
 0x51d   :  { %v1320_v35 = vpop.f32.mrf.mxu0 }
 0x51e   :  { %v1444_v19 = vsel %vm173_vm1, %v1320_v35, -inf }
 0x520   :  { %v1292_v59 = vpop.f32.mrf.mxu3 }
 0x521   :  { %v1441_v25 = vsel %vm173_vm1, %v1292_v59, -inf }
 0x522   :  { %1442 = vmax.xlane.f32.xlu0 %v1441_v25 }
 0x523   :  { %1445 = vmax.xlane.f32.xlu1 %v1444_v19 }
 0x525   :  { %v3983_v56 = vpop.f32.mrf.mxu0 }
 0x526   :  { %v1456_v21 = vsel %vm173_vm1, %v3983_v56, -inf }
 0x527   :  { %1457 = vmax.xlane.f32.xlu2 %v1456_v21 }
 0x528   :  { %v1404_v5 = vpop.f32.mrf.mxu3 }
 0x529   :  { %v1453_v36 = vsel %vm173_vm1, %v1404_v5, -inf }
 0x52f   :  { %1451 = vmax.xlane.f32.xlu2 %v1450_v10 }
 0x537   :  { %1454 = vmax.xlane.f32.xlu2 %v1453_v36 }
 0x53c   :  { %1761 = vrot.lane.b32.xlu1 %v3559_v16, %s3452_s6 }
 0x544   :  { %v1437_v9 = vpop.xlane.xlu1 %1436 }
 0x545   :  { %v1459_v12 = vsub.f32 %v1236_v58, %v1437_v9 }
 0x547   :  { %v1467_v23 = vmul.f32 1.442695, %v1459_v12 }
 0x549   :  { %3225 = vpow2.f32 %v1467_v23 }
 0x54f   :  { %v3993_v13 = vpop.eup %3225 }
 0x550   :  { %v1483_v1 = vsel %vm173_vm1, %v3993_v13, 0.0 }
 0x55a   :  { %v1440_v2 = vpop.xlane.xlu2 %1439 }
 0x55b   :  { %v1460_v57 = vsub.f32 %v1264_v62, %v1440_v2 }
 0x55d   :  { %v1469_v8 = vmul.f32 1.442695, %v1460_v57 }
 0x55f   :  { %3227 = vpow2.f32 %v1469_v8 }
 0x565   :  { %v3997_v31 = vpop.eup %3227 }
 0x566   :  { %1484 = vadd.xlane.f32.xlu1 %v1483_v1  ;;  %v1486_v16 = vsel %vm173_vm1, %v3997_v31, 0.0 }
 0x567   :  { %1487 = vadd.xlane.f32.xlu0 %v1486_v16 }
 0x57b   :  { %1787 = vrot.lane.b32.xlu0 %v3577_v27, %s3453_s25 }
 0x583   :  { %1601 = vrot.lane.b32.xlu0 %v3565_v20, %s3451_s2 }
 0x58b   :  { %1705 = vrot.lane.b32.xlu0 %v3582_v29, %s3451_s2 }
 0x58e   :  { %v1449_v49 = vpop.xlane.xlu1 %1448 }
 0x58f   :  { %v1463_v55 = vsub.f32 %v1348_v15, %v1449_v49 }
 0x591   :  { %v1475_v54 = vmul.f32 1.442695, %v1463_v55 }
 0x593   :  { %3229 = vpow2.f32 %v1475_v54  ;;  %1817 = vrot.lane.b32.xlu0 %v3565_v20, %s3452_s6 }
 0x595   :  { %v1443_v4 = vpop.xlane.xlu0 %1442 }
 0x596   :  { %v1461_v58 = vsub.f32 %v1292_v59, %v1443_v4  ;;  %v1446_v27 = vpop.xlane.xlu1 %1445 }
 0x597   :  { %v1462_v17 = vsub.f32 %v1320_v35, %v1446_v27 }
 0x598   :  { %v1471_v62 = vmul.f32 1.442695, %v1461_v58 }
 0x599   :  { %v4013_v60 = vpop.eup %3229  ;;  %v1473_v3 = vmul.f32 1.442695, %v1462_v17 }
 0x59a   :  { %3231 = vpow2.f32 %v1471_v62  ;;  %v1495_v25 = vsel %vm173_vm1, %v4013_v60, 0.0  ;;  %v1458_v19 = vpop.xlane.xlu2 %1457 }
 0x59b   :  { %3233 = vpow2.f32 %v1473_v3  ;;  %1496 = vadd.xlane.f32.xlu2 %v1495_v25  ;;  %1873 = vrot.lane.b32.xlu0 %v3571_v24, %s3452_s6 }
 0x5a0   :  { %v4019_v15 = vpop.eup %3231 }
 0x5a1   :  { %v4021_v20 = vpop.eup %3233  ;;  %v1489_v35 = vsel %vm173_vm1, %v4019_v15, 0.0 }
 0x5a2   :  { %v1492_v59 = vsel %vm173_vm1, %v4021_v20, 0.0  ;;  %v1452_v21 = vpop.xlane.xlu2 %1451 }
 0x5a3   :  { %1493 = vadd.xlane.f32.xlu1 %v1492_v59  ;;  %1490 = vadd.xlane.f32.xlu2 %v1489_v35  ;;  %v1464_v24 = vsub.f32 %v1376_v40, %v1452_v21 }
 0x5a4   :  { %1871 = vrot.lane.b32.xlu0 %v3641_v44, %s3453_s25 }
 0x5a5   :  { %v1477_v10 = vmul.f32 1.442695, %v1464_v24 }
 0x5a7   :  { %3235 = vpow2.f32 %v1477_v10 }
 0x5aa   :  { %v1455_v36 = vpop.xlane.xlu2 %1454 }
 0x5ab   :  { %v1465_v9 = vsub.f32 %v1404_v5, %v1455_v36 }
 0x5ad   :  { %v1479_v12 = vmul.f32 1.442695, %v1465_v9  ;;  %v3236_v23 = vpop.eup %3235 }
 0x5ae   :  { %v1498_v44 = vsel %vm173_vm1, %v3236_v23, 0.0  ;;  %v1762_v40 = vpop.permute.xlu1 %1761 }
 0x5af   :  { %3237 = vpow2.f32 %v1479_v12 }
 0x5bb   :  { %1789 = vrot.lane.b32.xlu2 %v3562_v18, %s3452_s6  ;;  %v1466_v18 = vsub.f32 %v3983_v56, %v1458_v19 }
 0x5bc   :  { %1815 = vrot.lane.b32.xlu1 %v3638_v43, %s3453_s25  ;;  %v3238_v43 = vpop.eup %3237 }
 0x5bd   :  { %v1481_v2 = vmul.f32 1.442695, %v1466_v18  ;;  %v1501_v57 = vsel %vm173_vm1, %v3238_v43, 0.0 }
 0x5bf   :  { %3239 = vpow2.f32 %v1481_v2 }
 0x5c4   :  { %1901 = vrot.lane.b32.xlu1 %v3574_v26, %s3452_s6 }
 0x5c5   :  { %v4040_v1 = vpop.eup %3239 }
 0x5c6   :  { %v1504_v56 = vsel %vm173_vm1, %v4040_v1, 0.0 }
 0x5cc   :  { %1929 = vrot.lane.b32.xlu1 %v3582_v29, %s3452_s6 }
 0x5ce   :  { %1499 = vadd.xlane.f32.xlu0 %v1498_v44 }
 0x5d6   :  { %1502 = vadd.xlane.f32.xlu0 %v1501_v57 }
 0x5d9   :  { %v1485_v5 = vpop.xlane.xlu1 %1484 }
 0x5da   :  { %3241 = vrcp.f32 %v1485_v5  ;;  %v1488_v8 = vpop.xlane.xlu0 %1487 }
 0x5db   :  { %3243 = vrcp.f32 %v1488_v8 }
 0x5e0   :  { %v3242_v16 = vpop.eup %3241 }
 0x5e1   :  { %v1515_v49 = vmul.f32 %v3242_v16, %v3993_v13  ;;  %v3244_v55 = vpop.eup %3243 }
 0x5e2   :  { %v1516_v54 = vmul.f32 %v3244_v55, %v3997_v31 }
 0x5e3   :  { %3006 = vmatmul.msk.f32.vlgmr.msra.gmra.mxu1 %vm173_vm1, %v1515_v49 }
 0x5e4   :  { %3014 = vmatpush.xpose.msk.msra.mxu1 %vm173_vm1, %v3991_v6  ;;  %1505 = vadd.xlane.f32.xlu2 %v1504_v56 }
 0x5e5   :  { %3007 = vmatmul.msk.f32.vlgmr.msrb.gmra.mxu2 %vm173_vm1, %v1516_v54 }
 0x5e6   :  { %3016 = vmatpush.xpose.msk.msrb.mxu2 %vm173_vm1, %v1762_v40 }
 0x5ea   :  { %1843 = vrot.lane.b32.xlu0 %v3626_v39, %s3453_s25 }
 0x5ed   :  { %v1788_v13 = vpop.permute.xlu0 %1787 }
 0x5f2   :  { %1899 = vrot.lane.b32.xlu0 %v3649_v46, %s3453_s25 }
 0x5f5   :  { %v1602_v31 = vpop.permute.xlu0 %1601 }
 0x5f6   :  { %1622 = vmatpush.msra.mxu0 %v1602_v31 }
 0x5fa   :  { %1927 = vrot.lane.b32.xlu0 %v3655_v50, %s3453_s25  ;;  %s2923_s25 = sshll.u32 %s4405_s9, 4  ;;  %s2924_s25 = int_to_ptr.hbm [resolvable:$true] %s2923_s25 }
 0x5fc   :  { %1845 = vrot.lane.b32.xlu2 %v3568_v22, %s3452_s6 }
 0x5fd   :  { %v1706_v6 = vpop.permute.xlu0 %1705 }
 0x5fe   :  { %1726 = vmatpush.msrb.mxu0 %v1706_v6 }
 0x605   :  { %v1818_v25 = vpop.permute.xlu0 %1817 }
 0x60e   :  { %v1497_v4 = vpop.xlane.xlu2 %1496 }
 0x60f   :  { %3245 = vrcp.f32 %v1497_v4 }
 0x615   :  { %v3246_v58 = vpop.eup %3245 }
 0x616   :  { %v1519_v27 = vmul.f32 %v3246_v58, %v4013_v60  ;;  %v1494_v39 = vpop.xlane.xlu1 %1493  ;;  %v1491_v17 = vpop.xlane.xlu2 %1490 }
 0x617   :  { %3247 = vrcp.f32 %v1494_v39  ;;  %v1874_v60 = vpop.permute.xlu0 %1873 }
 0x618   :  { %3249 = vrcp.f32 %v1491_v17  ;;  %3010 = vmatmul.msk.f32.vlgmr.msrb.gmra.mxu1 %vm173_vm1, %v1519_v27 }
 0x61d   :  { %v3248_v46 = vpop.eup %3247 }
 0x61e   :  { %v3250_v62 = vpop.eup %3249  ;;  %v1518_v50 = vmul.f32 %v3248_v46, %v4021_v20  ;;  %v1790_v22 = vpop.permute.xlu2 %1789 }
 0x61f   :  { %v1517_v3 = vmul.f32 %v3250_v62, %v4019_v15  ;;  %v1872_v35 = vpop.permute.xlu0 %1871 }
 0x620   :  { %3009 = vmatmul.msk.f32.vlgmr.msra.gmra.mxu0 %vm173_vm1, %v1518_v50  ;;  %3015 = vmatmul.msk.f32.vlgmr.msra.gmra.mxu1 %vm173_vm1, %v4009_v48 }
 0x621   :  { %3008 = vmatmul.msk.f32.vlgmr.msra.gmra.mxu3 %vm173_vm1, %v1517_v3  ;;  %3020 = vmatpush.xpose.msk.msra.mxu0 %vm173_vm1, %v1818_v25 }
 0x622   :  { %3018 = vmatpush.xpose.msk.msra.mxu3 %vm173_vm1, %v1790_v22 }
 0x62e   :  { %v1816_v19 = vpop.permute.xlu1 %1815 }
 0x636   :  { %v1902_v10 = vpop.permute.xlu1 %1901 }
 0x63e   :  { %v1930_v18 = vpop.permute.xlu1 %1929 }
 0x641   :  { %v1500_v59 = vpop.xlane.xlu0 %1499 }
 0x642   :  { %3251 = vrcp.f32 %v1500_v59 }
 0x648   :  { %v3252_v20 = vpop.eup %3251 }
 0x649   :  { %v1520_v15 = vmul.f32 %v3252_v20, %v3236_v23  ;;  %v1503_v21 = vpop.xlane.xlu0 %1502 }
 0x64a   :  { %3253 = vrcp.f32 %v1503_v21 }
 0x64b   :  { %3011 = vmatmul.msk.f32.vlgmr.msra.gmra.mxu2 %vm173_vm1, %v1520_v15 }
 0x64c   :  { %3024 = vmatpush.xpose.msk.msra.mxu2 %vm173_vm1, %v1874_v60 }
 0x650   :  { %v3254_v48 = vpop.eup %3253 }
 0x651   :  { %v1521_v24 = vmul.f32 %v3254_v48, %v3238_v43 }
 0x653   :  { %3012 = vmatmul.msk.f32.vlgmr.msrb.gmra.mxu3 %vm173_vm1, %v1521_v24  ;;  %3017 = vmatmul.msk.f32.vlgmr.msrb.gmra.mxu2 %vm173_vm1, %v4003_v37 }
 0x654   :  { %3026 = vmatpush.xpose.msk.msrb.mxu3 %vm173_vm1, %v1902_v10 }
 0x657   :  { %v1506_v36 = vpop.xlane.xlu2 %1505 }
 0x658   :  { %3255 = vrcp.f32 %v1506_v36 }
 0x65b   :  { %3019 = vmatmul.msk.f32.vlgmr.msra.gmra.mxu3 %vm173_vm1, %v1788_v13  ;;  %3025 = vmatmul.msk.f32.vlgmr.msra.gmra.mxu2 %vm173_vm1, %v1872_v35 }
 0x65c   :  { %v1844_v9 = vpop.permute.xlu0 %1843 }
 0x65e   :  { %v3256_v12 = vpop.eup %3255 }
 0x65f   :  { %v1522_v23 = vmul.f32 %v3256_v12, %v4040_v1  ;;  %v1846_v44 = vpop.permute.xlu2 %1845 }
 0x660   :  { %3022 = vmatpush.xpose.msk.msrb.mxu1 %vm173_vm1, %v1846_v44  ;;  %v4085_v43 = vpop.f32.mrf.mxu1 }
 0x661   :  { %3013 = vmatmul.msk.f32.vlgmr.msrb.gmra.mxu0 %vm173_vm1, %v1522_v23 }
 0x662   :  { %3028 = vmatpush.xpose.msk.msrb.mxu0 %vm173_vm1, %v1930_v18 }
 0x663   :  { %3023 = vmatmul.msk.f32.vlgmr.msrb.gmra.mxu1 %vm173_vm1, %v1844_v9 }
 0x664   :  { %v1900_v37 = vpop.permute.xlu0 %1899 }
 0x665   :  { %3027 = vmatmul.msk.f32.vlgmr.msrb.gmra.mxu3 %vm173_vm1, %v1900_v37 }
 0x668   :  { %v4090_v8 = vpop.f32.mrf.mxu2 }
 0x669   :  { %3021 = vmatmul.msk.f32.vlgmr.msra.gmra.mxu0 %vm173_vm1, %v1816_v19 }
 0x66c   :  { %v1928_v40 = vpop.permute.xlu0 %1927 }
 0x671   :  { %3029 = vmatmul.msk.f32.vlgmr.msrb.gmra.mxu0 %vm173_vm1, %v1928_v40 }
 0x695   :  { %v4087_v2 = vpop.f32.mrf.mxu1 }
 0x69d   :  { %v1756_v57 = vpop.f32.mrf.mxu1  ;;  %v4098_v54 = vpop.f32.mrf.mxu0 }
 0x69e   :  { %v1955_v5 = vsel %vm173_vm1, %v1756_v57, -inf }
 0x69f   :  { %1956 = vmax.xlane.f32.xlu2 %v1955_v5 }
 0x6a4   :  { %v4092_v1 = vpop.f32.mrf.mxu3 }
 0x6ce   :  { %v4094_v16 = vpop.f32.mrf.mxu2 }
 0x6d6   :  { %v4096_v49 = vpop.f32.mrf.mxu3  ;;  %v1784_v55 = vpop.f32.mrf.mxu2 }
 0x6d7   :  { %v1958_v56 = vsel %vm173_vm1, %v1784_v55, -inf }
 0x6d8   :  { %1959 = vmax.xlane.f32.xlu1 %v1958_v56 }
 0x6de   :  { %v4101_v13 = vpop.f32.mrf.mxu3  ;;  %v4103_v31 = vpop.f32.mrf.mxu0 }
 0x6df   :  { %v1961_v6 = vsel %vm173_vm1, %v4101_v13, -inf  ;;  %v4108_v27 = vpop.f32.mrf.mxu2 }
 0x6e0   :  { %1962 = vmax.xlane.f32.xlu0 %v1961_v6  ;;  %v1868_v4 = vpop.f32.mrf.mxu1  ;;  %v1970_v17 = vsel %vm173_vm1, %v4108_v27, -inf }
 0x6e1   :  { %v1967_v58 = vsel %vm173_vm1, %v1868_v4, -inf }
 0x6e2   :  { %1968 = vmax.xlane.f32.xlu1 %v1967_v58 }
 0x6e6   :  { %v1840_v39 = vpop.f32.mrf.mxu0 }
 0x6e7   :  { %v1964_v46 = vsel %vm173_vm1, %v1840_v39, -inf }
 0x6e8   :  { %1971 = vmax.xlane.f32.xlu0 %v1970_v17  ;;  %1965 = vmax.xlane.f32.xlu2 %v1964_v46  ;;  %v1924_v3 = vpop.f32.mrf.mxu3 }
 0x6e9   :  { %v1973_v22 = vsel %vm173_vm1, %v1924_v3, -inf }
 0x6ee   :  { %v1952_v62 = vpop.f32.mrf.mxu0 }
 0x6ef   :  { %v1976_v50 = vsel %vm173_vm1, %v1952_v62, -inf }
 0x6f0   :  { %1977 = vmax.xlane.f32.xlu2 %v1976_v50 }
 0x6f8   :  { %1974 = vmax.xlane.f32.xlu2 %v1973_v22 }
 0x6fb   :  { %3141 = vrot.lane.b32.xlu1 %v3594_v32, %s3454_s26 }
 0x710   :  { %3146 = vrot.lane.b32.xlu2 %v3586_v30, %s3454_s26 }
 0x712   :  { %v1957_v25 = vpop.xlane.xlu2 %1956 }
 0x713   :  { %v1979_v60 = vsub.f32 %v1756_v57, %v1957_v25 }
 0x715   :  { %v1987_v35 = vmul.f32 1.442695, %v1979_v60 }
 0x717   :  { %3257 = vpow2.f32 %v1987_v35 }
 0x71d   :  { %v4119_v59 = vpop.eup %3257 }
 0x71e   :  { %v2003_v20 = vsel %vm173_vm1, %v4119_v59, 0.0 }
 0x725   :  { %2004 = vadd.xlane.f32.xlu1 %v2003_v20 }
 0x73e   :  { %3151 = vrot.lane.b32.xlu1 %v3601_v33, %s3454_s26 }
 0x74b   :  { %v1960_v19 = vpop.xlane.xlu1 %1959 }
 0x74c   :  { %v1980_v12 = vsub.f32 %v1784_v55, %v1960_v19 }
 0x74e   :  { %v1989_v18 = vmul.f32 1.442695, %v1980_v12 }
 0x753   :  { %v1963_v33 = vpop.xlane.xlu0 %1962 }
 0x754   :  { %v1981_v55 = vsub.f32 %v4101_v13, %v1963_v33 }
 0x755   :  { %v1969_v15 = vpop.xlane.xlu1 %1968 }
 0x756   :  { %v1983_v48 = vsub.f32 %v1868_v4, %v1969_v15  ;;  %v1991_v46 = vmul.f32 1.442695, %v1981_v55 }
 0x758   :  { %v1995_v30 = vmul.f32 1.442695, %v1983_v48 }
 0x75b   :  { %v1966_v21 = vpop.xlane.xlu2 %1965 }
 0x75c   :  { %v1982_v32 = vsub.f32 %v1840_v39, %v1966_v21 }
 0x75e   :  { %v1993_v24 = vmul.f32 1.442695, %v1982_v32 }
 0x760   :  { %3259 = vpow2.f32 %v1993_v24 }
 0x761   :  { %3261 = vpow2.f32 %v1995_v30 }
 0x763   :  { %v1978_v10 = vpop.xlane.xlu2 %1977 }
 0x764   :  { %v1986_v36 = vsub.f32 %v1952_v62, %v1978_v10  ;;  %v1972_v62 = vpop.xlane.xlu0 %1971 }
 0x765   :  { %v1984_v13 = vsub.f32 %v4108_v27, %v1972_v62 }
 0x766   :  { %v4125_v9 = vpop.eup %3259  ;;  %v2001_v23 = vmul.f32 1.442695, %v1986_v36 }
 0x767   :  { %v2012_v44 = vsel %vm173_vm1, %v4125_v9, 0.0  ;;  %v4129_v40 = vpop.eup %3261  ;;  %v1997_v19 = vmul.f32 1.442695, %v1984_v13 }
 0x768   :  { %3263 = vpow2.f32 %v2001_v23  ;;  %2013 = vadd.xlane.f32.xlu0 %v2012_v44  ;;  %v2015_v39 = vsel %vm173_vm1, %v4129_v40, 0.0 }
 0x769   :  { %3265 = vpow2.f32 %v1989_v18 }
 0x76b   :  { %v1975_v37 = vpop.xlane.xlu2 %1974 }
 0x76c   :  { %v1985_v57 = vsub.f32 %v1924_v3, %v1975_v37 }
 0x76d   :  { %v3142_v5 = vpop.permute.xlu1 %3141 }
 0x76e   :  { %v3144_v56 = vunpack.i.h.bf16 %v3142_v5  ;;  %v3143_v6 = vunpack.i.l.bf16 %v3142_v5  ;;  %v4131_v4 = vpop.eup %3263  ;;  %v1999_v58 = vmul.f32 1.442695, %v1985_v57 }
 0x76f   :  { %v2024_v17 = vsel %vm173_vm1, %v4131_v4, 0.0  ;;  %v3266_v3 = vpop.eup %3265 }
 0x770   :  { %2064 = vmatpush.msra.mxu1 %v3143_v6  ;;  %2090 = vmatpush.msrb.mxu2 %v3144_v56  ;;  %3267 = vpow2.f32 %v1999_v58  ;;  %v2006_v35 = vsel %vm173_vm1, %v3266_v3, 0.0 }
 0x771   :  { %2016 = vadd.xlane.f32.xlu0 %v2015_v39  ;;  %2025 = vadd.xlane.f32.xlu1 %v2024_v17  ;;  %3269 = vpow2.f32 %v1991_v46 }
 0x772   :  { %3271 = vpow2.f32 %v1997_v19  ;;  %v2447_v19 = vld [vmem:[#allocation7 + $0x8] sm:$0xff] }
 0x773   :  { %v3147_v50 = vpop.permute.xlu2 %3146 }
 0x774   :  { %v3149_v22 = vunpack.i.h.bf16 %v3147_v50  ;;  %v3148_v25 = vunpack.i.l.bf16 %v3147_v50  ;;  %v2375_v50 = vld [vmem:[#allocation5 + $0x10] sm:$0xff] }
 0x776   :  { %v4138_v60 = vpop.eup %3267  ;;  %2116 = vmatpush.msra.mxu3 %v3148_v25  ;;  %2142 = vmatpush.msra.mxu0 %v3149_v22 }
 0x777   :  { %v2021_v20 = vsel %vm173_vm1, %v4138_v60, 0.0  ;;  %v3270_v15 = vpop.eup %3269 }
 0x778   :  { %2022 = vadd.xlane.f32.xlu2 %v2021_v20  ;;  %v2009_v21 = vsel %vm173_vm1, %v3270_v15, 0.0  ;;  %v3272_v32 = vpop.eup %3271  ;;  %v2448_v20 = vld [vmem:[#allocation7 + $0x10] sm:$0xff] }
 0x779   :  { %2007 = vadd.xlane.f32.xlu0 %v2006_v35  ;;  %v2018_v48 = vsel %vm173_vm1, %v3272_v32, 0.0 }
 0x781   :  { %2010 = vadd.xlane.f32.xlu0 %v2009_v21 }
 0x789   :  { %2019 = vadd.xlane.f32.xlu0 %v2018_v48 }
 0x78a   :  { %2261 = vrot.lane.b32.xlu1 %v3967_v41, %s3441_s18 }
 0x798   :  { %v2005_v27 = vpop.xlane.xlu1 %2004 }
 0x799   :  { %3273 = vrcp.f32 %v2005_v27 }
 0x79d   :  { %2199 = vrot.lane.b32.xlu0 %v3574_v26, %s3454_s26 }
 0x79f   :  { %v3274_v24 = vpop.eup %3273 }
 0x7a0   :  { %v2035_v30 = vmul.f32 %v3274_v24, %v4119_v59 }
 0x7a2   :  { %3030 = vmatmul.msk.f32.vlgmr.msra.gmra.mxu1 %vm173_vm1, %v2035_v30 }
 0x7a5   :  { %2225 = vrot.lane.b32.xlu0 %v3582_v29, %s3454_s26 }
 0x7ad   :  { %2259 = vrot.lane.b32.xlu0 %v3962_v7, %s3441_s18 }
 0x7b0   :  { %v3152_v10 = vpop.permute.xlu1 %3151 }
 0x7b1   :  { %v3154_v36 = vunpack.i.h.bf16 %v3152_v10  ;;  %v3153_v12 = vunpack.i.l.bf16 %v3152_v10 }
 0x7b3   :  { %2168 = vmatpush.msrb.mxu1 %v3153_v12  ;;  %2194 = vmatpush.msra.mxu2 %v3154_v36 }
 0x7b5   :  { %2291 = vrot.lane.b32.xlu0 %v4085_v43, %s3455_s27 }
 0x7bd   :  { %2293 = vrot.lane.b32.xlu0 %v4090_v8, %s3455_s27 }
 0x7db   :  { %v2014_v26 = vpop.xlane.xlu0 %2013 }
 0x7dc   :  { %3275 = vrcp.f32 %v2014_v26 }
 0x7e2   :  { %v3276_v41 = vpop.eup %3275 }
 0x7e3   :  { %v2038_v29 = vmul.f32 %v3276_v41, %v4125_v9 }
 0x7e4   :  { %v2017_v59 = vpop.xlane.xlu0 %2016 }
 0x7e5   :  { %3277 = vrcp.f32 %v2017_v59  ;;  %3033 = vmatmul.msk.f32.vlgmr.msra.gmra.mxu0 %vm173_vm1, %v2038_v29 }
 0x7eb   :  { %v3278_v7 = vpop.eup %3277  ;;  %v2023_v5 = vpop.xlane.xlu2 %2022 }
 0x7ec   :  { %v2039_v23 = vmul.f32 %v3278_v7, %v4129_v40  ;;  %v2008_v44 = vpop.xlane.xlu0 %2007  ;;  %v2026_v40 = vpop.xlane.xlu1 %2025 }
 0x7ed   :  { %3279 = vrcp.f32 %v2008_v44 }
 0x7ee   :  { %3034 = vmatmul.msk.f32.vlgmr.msrb.gmra.mxu1 %vm173_vm1, %v2039_v23 }
 0x7f3   :  { %v3280_v43 = vpop.eup %3279 }
 0x7f4   :  { %v2036_v33 = vmul.f32 %v3280_v43, %v3266_v3  ;;  %v2011_v18 = vpop.xlane.xlu0 %2010  ;;  %v2373_v3 = vld [vmem:[#allocation5] sm:$0xff] }
 0x7f5   :  { %3281 = vrcp.f32 %v2011_v18 }
 0x7f6   :  { %3031 = vmatmul.msk.f32.vlgmr.msrb.gmra.mxu2 %vm173_vm1, %v2036_v33 }
 0x7fb   :  { %v3282_v8 = vpop.eup %3281 }
 0x7fc   :  { %v2037_v37 = vmul.f32 %v3282_v8, %v3270_v15  ;;  %v2020_v9 = vpop.xlane.xlu0 %2019  ;;  %v2262_v21 = vpop.permute.xlu1 %2261 }
 0x7fd   :  { %3283 = vrcp.f32 %v2020_v9 }
 0x7fe   :  { %3032 = vmatmul.msk.f32.vlgmr.msra.gmra.mxu3 %vm173_vm1, %v2037_v37  ;;  %3285 = vrcp.f32 %v2023_v5 }
 0x7ff   :  { %3287 = vrcp.f32 %v2026_v40 }
 0x803   :  { %v3284_v57 = vpop.eup %3283 }
 0x804   :  { %v2040_v56 = vmul.f32 %v3284_v57, %v3272_v32  ;;  %v3286_v6 = vpop.eup %3285 }
 0x805   :  { %v2041_v55 = vmul.f32 %v3286_v6, %v4138_v60  ;;  %v3288_v39 = vpop.eup %3287 }
 0x806   :  { %3035 = vmatmul.msk.f32.vlgmr.msra.gmra.mxu2 %vm173_vm1, %v2040_v56  ;;  %v2042_v17 = vmul.f32 %v3288_v39, %v4131_v4  ;;  %v2376_v4 = vld [vmem:[#allocation5 + $0x18] sm:$0xff] }
 0x807   :  { %2417 = vmatpush.msra.mxu1 %v2376_v4 }
 0x809   :  { %2418 = vmatpush.msra.mxu1 %v2375_v50 }
 0x80f   :  { %v2200_v58 = vpop.permute.xlu0 %2199 }
 0x810   :  { %2220 = vmatpush.msrb.mxu3 %v2200_v58 }
 0x811   :  { %3036 = vmatmul.msk.f32.vlgmr.msrb.gmra.mxu3 %vm173_vm1, %v2041_v55 }
 0x817   :  { %v2226_v46 = vpop.permute.xlu0 %2225 }
 0x818   :  { %2246 = vmatpush.msrb.mxu0 %v2226_v46 }
 0x819   :  { %3037 = vmatmul.msk.f32.vlgmr.msrb.gmra.mxu0 %vm173_vm1, %v2042_v17 }
 0x81f   :  { %v2066_v62 = vpop.f32.mrf.mxu1 }
 0x820   :  { %2323 = vrot.lane.b32.xlu2 %v2066_v62, %s3456_s28 }
 0x828   :  { %2295 = vrot.lane.b32.xlu2 %v4092_v1, %s3455_s27  ;;  %v2374_v1 = vld [vmem:[#allocation5 + $0x8] sm:$0xff] }
 0x829   :  { %2419 = vmatpush.msra.mxu1 %v2374_v1 }
 0x82b   :  { %2420 = vmatpush.msra.mxu1 %v2373_v3 }
 0x830   :  { %2297 = vrot.lane.b32.xlu2 %v4098_v54, %s3455_s27  ;;  %v2260_v54 = vpop.permute.xlu0 %2259 }
 0x838   :  { %2299 = vrot.lane.b32.xlu2 %v4087_v2, %s3455_s27  ;;  %v2292_v2 = vpop.permute.xlu0 %2291 }
 0x840   :  { %2301 = vrot.lane.b32.xlu2 %v4094_v16, %s3455_s27  ;;  %v2347_v16 = vsel %vm173_vm1, %v3804_v11, %v2260_v54  ;;  %v2294_v15 = vpop.permute.xlu0 %2293  ;;  %v2533_v54 = vld [vmem:[%s4404_s8 + $0x30] sm:$0xff] }
 0x848   :  { %2303 = vrot.lane.b32.xlu2 %v4096_v49, %s3455_s27  ;;  %v2356_v49 = vsel %vm2355_vm2, %v2347_v16, %v2292_v2  ;;  %v2531_v2 = vld [vmem:[%s4404_s8 + $0x20] sm:$0xff]  ;;  %v2530_v16 = vld [vmem:[%s4404_s8 + $0x18] sm:$0xff] }
 0x850   :  { %2305 = vrot.lane.b32.xlu2 %v4103_v31, %s3455_s27 }
 0x862   :  { %v2144_v13 = vpop.f32.mrf.mxu0 }
 0x86b   :  { %v2170_v11 = vpop.f32.mrf.mxu1 }
 0x879   :  { %v2092_v22 = vpop.f32.mrf.mxu2 }
 0x87a   :  { %2325 = vrot.lane.b32.xlu0 %v2092_v22, %s3456_s28  ;;  %v2324_v25 = vpop.permute.xlu2 %2323  ;;  %v2529_v22 = vld [vmem:[%s4404_s8 + $0x10] sm:$0xff] }
 0x87b   :  { %v2365_v60 = vsel %vm2364_vm3, %v2356_v49, %v2324_v25  ;;  %v2528_v49 = vld [vmem:[%s4404_s8 + $0x8] sm:$0xff]  ;;  %v2527_v25 = vld [vmem:[%s4404_s8] sm:$0xff] }
 0x87c   :  { %3038 = vmatmul.msk.f32.vlgmr.msra.gmra.mxu1 %vm96_vm0, %v2365_v60 }
 0x881   :  { %v2118_v31 = vpop.f32.mrf.mxu3 }
 0x882   :  { %2263 = vrot.lane.b32.xlu0 %v3974_v34, %s3441_s18  ;;  %2327 = vrot.lane.b32.xlu1 %v2118_v31, %s3456_s28  ;;  %v2296_v32 = vpop.permute.xlu2 %2295 }
 0x889   :  { %v2196_v35 = vpop.f32.mrf.mxu2 }
 0x88a   :  { %2265 = vrot.lane.b32.xlu0 %v3972_v28, %s3441_s18  ;;  %2329 = vrot.lane.b32.xlu1 %v2144_v13, %s3456_s28  ;;  %v2298_v10 = vpop.permute.xlu2 %2297 }
 0x892   :  { %2267 = vrot.lane.b32.xlu0 %v3964_v61, %s3441_s18  ;;  %2331 = vrot.lane.b32.xlu1 %v2170_v11, %s3456_s28  ;;  %v2449_v61 = vld [vmem:[#allocation7 + $0x18] sm:$0xff]  ;;  %v2300_v44 = vpop.permute.xlu2 %2299 }
 0x893   :  { %2490 = vmatpush.msrb.mxu2 %v2449_v61 }
 0x894   :  { %v2222_v34 = vpop.f32.mrf.mxu3 }
 0x895   :  { %2491 = vmatpush.msrb.mxu2 %v2448_v20 }
 0x896   :  { %v2248_v28 = vpop.f32.mrf.mxu0 }
 0x897   :  { %2492 = vmatpush.msrb.mxu2 %v2447_v19 }
 0x89a   :  { %2269 = vrot.lane.b32.xlu0 %v3969_v14, %s3441_s18  ;;  %2333 = vrot.lane.b32.xlu1 %v2196_v35, %s3456_s28  ;;  %v2446_v14 = vld [vmem:[#allocation7] sm:$0xff]  ;;  %v2302_v57 = vpop.permute.xlu2 %2301 }
 0x89b   :  { %2493 = vmatpush.msrb.mxu2 %v2446_v14  ;;  %v4290_v35 = vld [vmem:[%s4403_s7] ss:$0 sm:$0xff] }
 0x8a2   :  { %2271 = vrot.lane.b32.xlu0 %v3978_v0, %s3441_s18  ;;  %2335 = vrot.lane.b32.xlu1 %v2222_v34, %s3456_s28  ;;  %v2348_v0 = vsel %vm173_vm1, %v3808_v45, %v2262_v21  ;;  %v4219_v45 = vld [vmem:[%s4401_s5] ss:$0 sm:$0xff]  ;;  %v2304_v55 = vpop.permute.xlu2 %2303 }
 0x8a3   :  { %v2357_v48 = vsel %vm2355_vm2, %v2348_v0, %v2294_v15 }
 0x8aa   :  { %2273 = vrot.lane.b32.xlu0 %v3976_v63, %s3441_s18  ;;  %2337 = vrot.lane.b32.xlu1 %v2248_v28, %s3456_s28 }
 0x8ec   :  { %v2326_v27 = vpop.permute.xlu0 %2325 }
 0x8ed   :  { %v2366_v63 = vsel %vm2364_vm3, %v2357_v48, %v2326_v27 }
 0x8ee   :  { %3039 = vmatmul.msk.f32.gmra.mxu1 %vm96_vm0, %v2366_v63 }
 0x8f4   :  { %v2264_v24 = vpop.permute.xlu0 %2263  ;;  %v2328_v30 = vpop.permute.xlu1 %2327 }
 0x8f5   :  { %v2349_v36 = vsel %vm173_vm1, %v3802_v38, %v2264_v24 }
 0x8f6   :  { %v2358_v12 = vsel %vm2355_vm2, %v2349_v36, %v2296_v32 }
 0x8f7   :  { %v2367_v26 = vsel %vm2364_vm3, %v2358_v12, %v2328_v30 }
 0x8f8   :  { %3040 = vmatmul.msk.f32.gmra.mxu1 %vm96_vm0, %v2367_v26  ;;  %v2601_v26 = vlaneseq }
 0x8f9   :  { %v2422_v41 = vpop.f32.mrf.mxu1 }
 0x8fa   :  { %v4224_v29 = vadd.f32 %v4219_v45, %v2422_v41  ;;  %v4325_v41 = vld [vmem:[%s4396_s0] sm:$0xff]  ;;  %s3458_s0 = smov [#allocation8]  }
 0x8fb   :  { %s2921_s24 = sshll.u32 %s3458_s0, 4  ;;  %s2922_s24 = int_to_ptr.vmem [resolvable:$true] %s2921_s24 }
 0x8fc   :  { %v2266_v59 = vpop.permute.xlu0 %2265  ;;  %v2330_v7 = vpop.permute.xlu1 %2329  ;;  %3046 = vmatmul.msk.f32.vlgmr.msrb.gmra.mxu2 %vm96_vm0, %v4224_v29 }
 0x8fd   :  { %v2350_v38 = vsel %vm173_vm1, %v3810_v47, %v2266_v59  ;;  %v2611_v59 = vperm.slane %v4325_v41, 0 }
 0x8fe   :  { %v2359_v23 = vsel %vm2355_vm2, %v2350_v38, %v2298_v10 }
 0x8ff   :  { %v2368_v43 = vsel %vm2364_vm3, %v2359_v23, %v2330_v7 }
 0x900   :  { %3041 = vmatmul.msk.f32.gmra.mxu1 %vm96_vm0, %v2368_v43 }
 0x904   :  { %v2268_v33 = vpop.permute.xlu0 %2267  ;;  %v2332_v18 = vpop.permute.xlu1 %2331 }
 0x905   :  { %v2351_v8 = vsel %vm173_vm1, %v3813_v51, %v2268_v33 }
 0x906   :  { %v2360_v37 = vsel %vm2355_vm2, %v2351_v8, %v2300_v44 }
 0x907   :  { %v2369_v9 = vsel %vm2364_vm3, %v2360_v37, %v2332_v18 }
 0x908   :  { %3042 = vmatmul.msk.f32.gmra.mxu1 %vm96_vm0, %v2369_v9 }
 0x90c   :  { %v2270_v47 = vpop.permute.xlu0 %2269  ;;  %v2334_v5 = vpop.permute.xlu1 %2333 }
 0x90d   :  { %v2352_v56 = vsel %vm173_vm1, %v3806_v42, %v2270_v47  ;;  %v2306_v42 = vpop.permute.xlu2 %2305 }
 0x90e   :  { %v2361_v40 = vsel %vm2355_vm2, %v2352_v56, %v2302_v57 }
 0x90f   :  { %v2370_v6 = vsel %vm2364_vm3, %v2361_v40, %v2334_v5  ;;  %v3457_v5 = vmov 0  }
 0x910   :  { %3043 = vmatmul.msk.f32.gmra.mxu1 %vm96_vm0, %v2370_v6  ;;  %3155 = vset.pattern.permute.xlu0 %v3457_v5 }
 0x911   :  { %3156 = vset.pattern.permute.xlu2 %v3457_v5  ;;  %3157 = vset.pattern.permute.xlu1 %v3457_v5 }
 0x914   :  { %v2272_v51 = vpop.permute.xlu0 %2271  ;;  %v2336_v58 = vpop.permute.xlu1 %2335 }
 0x915   :  { %v2353_v39 = vsel %vm173_vm1, %v3815_v52, %v2272_v51  ;;  %v2534_v52 = vld [vmem:[%s4404_s8 + $0x38] sm:$0xff] }
 0x916   :  { %v2362_v17 = vsel %vm2355_vm2, %v2353_v39, %v2304_v55  ;;  %2568 = vmatpush.msra.mxu0 %v2534_v52  ;;  %3062 = vmatpush.msra.mxu3 %v2534_v52 }
 0x917   :  { %v2371_v46 = vsel %vm2364_vm3, %v2362_v17, %v2336_v58 }
 0x918   :  { %3044 = vmatmul.msk.f32.gmra.mxu1 %vm96_vm0, %v2371_v46  ;;  %2569 = vmatpush.msra.mxu0 %v2533_v54 }
 0x919   :  { %3063 = vmatpush.msra.mxu3 %v2533_v54 }
 0x91c   :  { %v2274_v62 = vpop.permute.xlu0 %2273  ;;  %v2338_v50 = vpop.permute.xlu1 %2337 }
 0x91d   :  { %v2354_v4 = vsel %vm173_vm1, %v3817_v53, %v2274_v62  ;;  %v2532_v53 = vld [vmem:[%s4404_s8 + $0x28] sm:$0xff]  ;;  %vm2904_vm1 = vcmask 1043459  }
 0x91e   :  { %v2363_v1 = vsel %vm2355_vm2, %v2354_v4, %v2306_v42  ;;  %2570 = vmatpush.msra.mxu0 %v2532_v53  ;;  %3064 = vmatpush.msra.mxu3 %v2532_v53  ;;  %vm2906_vm2 = vcmask 1044484  }
 0x91f   :  { %v2372_v3 = vsel %vm2364_vm3, %v2363_v1, %v2338_v50  ;;  %vm2908_vm3 = vcmask 1045509  }
 0x920   :  { %3045 = vmatmul.msk.f32.gmra.mxu1 %vm96_vm0, %v2372_v3  ;;  %2571 = vmatpush.msra.mxu0 %v2531_v2 }
 0x921   :  { %3065 = vmatpush.msra.mxu3 %v2531_v2 }
 0x922   :  { %2572 = vmatpush.msra.mxu0 %v2530_v16 }
 0x923   :  { %3066 = vmatpush.msra.mxu3 %v2530_v16 }
 0x924   :  { %2573 = vmatpush.msra.mxu0 %v2529_v22 }
 0x925   :  { %3067 = vmatpush.msra.mxu3 %v2529_v22 }
 0x926   :  { %2574 = vmatpush.msra.mxu0 %v2528_v49 }
 0x927   :  { %3068 = vmatpush.msra.mxu3 %v2528_v49 }
 0x928   :  { %2575 = vmatpush.msra.mxu0 %v2527_v25 }
 0x929   :  { %3069 = vmatpush.msra.mxu3 %v2527_v25 }
 0x96b   :  { %v2425_v60 = vpop.f32.mrf.mxu1 }
 0x96c   :  { %v4278_v31 = vadd.f32 %v4219_v45, %v2425_v60 }
 0x96e   :  { %3047 = vmatmul.msk.f32.gmra.mxu2 %vm96_vm0, %v4278_v31 }
 0x975   :  { %v2428_v13 = vpop.f32.mrf.mxu1 }
 0x976   :  { %v4283_v11 = vadd.f32 %v4219_v45, %v2428_v13 }
 0x978   :  { %3048 = vmatmul.msk.f32.gmra.mxu2 %vm96_vm0, %v4283_v11 }
 0x97d   :  { %v2431_v34 = vpop.f32.mrf.mxu1 }
 0x97e   :  { %v4293_v28 = vadd.f32 %v4219_v45, %v2431_v34  ;;  %v2604_v34 = vrot.slane %v4325_v41, 1 }
 0x97f   :  { %v2495_v61 = vpop.f32.mrf.mxu2 }
 0x980   :  { %v2496_v20 = vadd.f32 %v4290_v35, %v2495_v61  ;;  %3049 = vmatmul.msk.f32.gmra.mxu2 %vm96_vm0, %v4293_v28  ;;  %v2612_v61 = vperm.slane %v2604_v34, 0  ;;  %v2609_v34 = vrot.slane %v4325_v41, 6 }
 0x982   :  { %3289 = vtanh.f32 %v2496_v20 }
 0x985   :  { %v2434_v19 = vpop.f32.mrf.mxu1 }
 0x986   :  { %v4299_v14 = vadd.f32 %v4219_v45, %v2434_v19 }
 0x988   :  { %v3290_v15 = vpop.eup %3289  ;;  %3050 = vmatmul.msk.f32.gmra.mxu2 %vm96_vm0, %v4299_v14 }
 0x989   :  { %3054 = vmatmul.msk.f32.vlgmr.msra.gmra.mxu0 %vm2535_vm4, %v3290_v15 }
 0x98d   :  { %v2437_v21 = vpop.f32.mrf.mxu1 }
 0x98e   :  { %v4305_v0 = vadd.f32 %v4219_v45, %v2437_v21 }
 0x990   :  { %3051 = vmatmul.msk.f32.gmra.mxu2 %vm96_vm0, %v4305_v0 }
 0x995   :  { %v2440_v32 = vpop.f32.mrf.mxu1 }
 0x996   :  { %v4310_v48 = vadd.f32 %v4219_v45, %v2440_v32  ;;  %v2605_v32 = vrot.slane %v4325_v41, 2 }
 0x998   :  { %3052 = vmatmul.msk.f32.gmra.mxu2 %vm96_vm0, %v4310_v48 }
 0x99d   :  { %v2443_v27 = vpop.f32.mrf.mxu1 }
 0x99e   :  { %v4315_v63 = vadd.f32 %v4219_v45, %v2443_v27  ;;  %v4327_v45 = vshrl.u32 %v2601_v26, 7 }
 0x9a0   :  { %3053 = vmatmul.msk.f32.gmra.mxu2 %vm96_vm0, %v4315_v63  ;;  %vm2619_vm5 = vcmp.ge.s32.totalorder %v4327_v45, %v2611_v59  ;;  %vm2620_vm7 = vcmp.ge.s32.totalorder %v4327_v45, %v2612_v61 }
 0x9f1   :  { %v2498_v24 = vpop.f32.mrf.mxu2 }
 0x9f2   :  { %v2499_v30 = vadd.f32 %v4290_v35, %v2498_v24 }
 0x9f4   :  { %3291 = vtanh.f32 %v2499_v30  ;;  %v2613_v30 = vperm.slane %v2605_v32, 0 }
 0x9f6   :  { %vm2621_vm8 = vcmp.ge.s32.totalorder %v4327_v45, %v2613_v30  ;;  %v2617_v30 = vperm.slane %v2609_v34, 0 }
 0x9f8   :  { %vm2625_vm12 = vcmp.ge.s32.totalorder %v4327_v45, %v2617_v30 }
 0x9fa   :  { %v3292_v10 = vpop.eup %3291 }
 0x9fb   :  { %v2501_v36 = vpop.f32.mrf.mxu2  ;;  %3055 = vmatmul.msk.f32.gmra.mxu0 %vm2535_vm4, %v3292_v10 }
 0x9fc   :  { %v2502_v12 = vadd.f32 %v4290_v35, %v2501_v36 }
 0x9fe   :  { %3293 = vtanh.f32 %v2502_v12  ;;  %v2606_v12 = vrot.slane %v4325_v41, 3 }
 0xa03   :  { %v2504_v7 = vpop.f32.mrf.mxu2 }
 0xa04   :  { %v3294_v38 = vpop.eup %3293  ;;  %v2505_v23 = vadd.f32 %v4290_v35, %v2504_v7 }
 0xa05   :  { %3056 = vmatmul.msk.f32.vlgmr.msra.gmra.mxu3 %vm2535_vm4, %v3294_v38 }
 0xa06   :  { %3295 = vtanh.f32 %v2505_v23  ;;  %v2577_v44 = vpop.f32.mrf.mxu0 }
 0xa07   :  { %v2627_v43 = vsel %vm2619_vm5, -1e+30, %v2577_v44  ;;  %v2614_v44 = vperm.slane %v2606_v12, 0  ;;  %vm2912_vm5 = vcmask 1047559  }
 0xa08   :  { %v2636_v33 = vsel %vm2635_vm6, %v2627_v43, -inf }
 0xa09   :  { %v2637_v18 = vrot.slane %v2636_v33, 4  ;;  %vm2622_vm9 = vcmp.ge.s32.totalorder %v4327_v45, %v2614_v44  ;;  %v2610_v44 = vrot.slane %v4325_v41, 7 }
 0xa0b   :  { %v2638_v8 = vmax.f32 %v2636_v33, %v2637_v18  ;;  %v2507_v37 = vpop.f32.mrf.mxu2  ;;  %v2607_v18 = vrot.slane %v4325_v41, 4 }
 0xa0c   :  { %v3296_v9 = vpop.eup %3295  ;;  %v2508_v57 = vadd.f32 %v4290_v35, %v2507_v37 }
 0xa0d   :  { %v2639_v47 = vrot.slane %v2638_v8, 2  ;;  %3057 = vmatmul.msk.f32.gmra.mxu3 %vm2535_vm4, %v3296_v9 }
 0xa0e   :  { %3297 = vtanh.f32 %v2508_v57 }
 0xa0f   :  { %v2640_v56 = vmax.f32 %v2638_v8, %v2639_v47 }
 0xa11   :  { %v2641_v40 = vrot.slane %v2640_v56, 1 }
 0xa13   :  { %v2642_v6 = vmax.f32 %v2640_v56, %v2641_v40  ;;  %v2510_v55 = vpop.f32.mrf.mxu2  ;;  %v2615_v40 = vperm.slane %v2607_v18, 0 }
 0xa14   :  { %v3298_v51 = vpop.eup %3297  ;;  %v2511_v58 = vadd.f32 %v4290_v35, %v2510_v55 }
 0xa15   :  { %v2692_v39 = vsub.f32 %v2627_v43, %v2642_v6  ;;  %3058 = vmatmul.msk.f32.gmra.mxu3 %vm2535_vm4, %v3298_v51  ;;  %vm2623_vm10 = vcmp.ge.s32.totalorder %v4327_v45, %v2615_v40 }
 0xa16   :  { %3299 = vtanh.f32 %v2511_v58 }
 0xa17   :  { %v2700_v17 = vmul.f32 1.442695, %v2692_v39 }
 0xa19   :  { %3301 = vpow2.f32 %v2700_v17 }
 0xa1b   :  { %v2513_v46 = vpop.f32.mrf.mxu2 }
 0xa1c   :  { %v3300_v62 = vpop.eup %3299  ;;  %v2514_v42 = vadd.f32 %v4290_v35, %v2513_v46  ;;  %v2608_v46 = vrot.slane %v4325_v41, 5 }
 0xa1d   :  { %3059 = vmatmul.msk.f32.gmra.mxu3 %vm2535_vm4, %v3300_v62 }
 0xa1e   :  { %3303 = vtanh.f32 %v2514_v42 }
 0xa1f   :  { %v3302_v4 = vpop.eup %3301 }
 0xa20   :  { %v2716_v50 = vsel %vm2635_vm6, %v3302_v4, 0.0 }
 0xa21   :  { %v2717_v1 = vrot.slane %v2716_v50, 4 }
 0xa23   :  { %v2718_v3 = vadd.f32 %v2717_v1, %v2716_v50  ;;  %v2516_v52 = vpop.f32.mrf.mxu2 }
 0xa24   :  { %v3304_v54 = vpop.eup %3303  ;;  %v2517_v53 = vadd.f32 %v4290_v35, %v2516_v52 }
 0xa25   :  { %v2719_v2 = vrot.slane %v2718_v3, 2  ;;  %3060 = vmatmul.msk.f32.gmra.mxu3 %vm2535_vm4, %v3304_v54 }
 0xa26   :  { %3305 = vtanh.f32 %v2517_v53 }
 0xa27   :  { %v2720_v16 = vadd.f32 %v2719_v2, %v2718_v3  ;;  %v2616_v2 = vperm.slane %v2608_v46, 0 }
 0xa29   :  { %v2721_v22 = vrot.slane %v2720_v16, 1  ;;  %vm2624_vm11 = vcmp.ge.s32.totalorder %v4327_v45, %v2616_v2 }
 0xa2b   :  { %v2722_v49 = vadd.f32 %v2721_v22, %v2720_v16 }
 0xa2c   :  { %v3306_v25 = vpop.eup %3305 }
 0xa2d   :  { %3061 = vmatmul.msk.f32.gmra.mxu3 %vm2535_vm4, %v3306_v25  ;;  %3307 = vrcp.f32 %v2722_v49  ;;  %vm2910_vm4 = vcmask 1046534  }
 0xa33   :  { %v3308_v60 = vpop.eup %3307 }
 0xa34   :  { %v2780_v13 = vmul.f32 %v3308_v60, %v3302_v4 }
 0xa36   :  { %2790 = vperm.xlu0 %3155, %v2780_v13  }
 0xa78   :  { %v2580_v35 = vpop.f32.mrf.mxu0 }
 0xa79   :  { %v2628_v20 = vsel %vm2620_vm7, -1e+30, %v2580_v35 }
 0xa7a   :  { %v2643_v19 = vsel %vm2635_vm6, %v2628_v20, -inf }
 0xa7b   :  { %v2644_v15 = vrot.slane %v2643_v19, 4 }
 0xa7d   :  { %v2645_v21 = vmax.f32 %v2643_v19, %v2644_v15 }
 0xa7f   :  { %v2646_v27 = vrot.slane %v2645_v21, 2 }
 0xa81   :  { %v2647_v24 = vmax.f32 %v2645_v21, %v2646_v27 }
 0xa83   :  { %v2648_v10 = vrot.slane %v2647_v24, 1 }
 0xa85   :  { %v2649_v36 = vmax.f32 %v2647_v24, %v2648_v10 }
 0xa87   :  { %v2693_v26 = vsub.f32 %v2628_v20, %v2649_v36 }
 0xa88   :  { %v2583_v59 = vpop.f32.mrf.mxu3 }
 0xa89   :  { %v2702_v7 = vmul.f32 1.442695, %v2693_v26  ;;  %v2629_v38 = vsel %vm2621_vm8, -1e+30, %v2583_v59 }
 0xa8a   :  { %v2650_v23 = vsel %vm2635_vm6, %v2629_v38, -inf }
 0xa8b   :  { %3309 = vpow2.f32 %v2702_v7  ;;  %v2651_v43 = vrot.slane %v2650_v23, 4 }
 0xa8d   :  { %v2652_v33 = vmax.f32 %v2650_v23, %v2651_v43 }
 0xa8f   :  { %v2653_v8 = vrot.slane %v2652_v33, 2 }
 0xa90   :  { %v2586_v37 = vpop.f32.mrf.mxu3 }
 0xa91   :  { %v3310_v9 = vpop.eup %3309  ;;  %v2654_v57 = vmax.f32 %v2652_v33, %v2653_v8  ;;  %v2630_v47 = vsel %vm2622_vm9, -1e+30, %v2586_v37 }
 0xa92   :  { %v2723_v5 = vsel %vm2635_vm6, %v3310_v9, 0.0  ;;  %v2657_v56 = vsel %vm2635_vm6, %v2630_v47, -inf }
 0xa93   :  { %v2724_v6 = vrot.slane %v2723_v5, 4  ;;  %v2655_v55 = vrot.slane %v2654_v57, 1  ;;  %v2658_v51 = vrot.slane %v2657_v56, 4 }
 0xa95   :  { %v2725_v58 = vadd.f32 %v2724_v6, %v2723_v5  ;;  %v2656_v39 = vmax.f32 %v2654_v57, %v2655_v55  ;;  %v2659_v17 = vmax.f32 %v2657_v56, %v2658_v51  ;;  %v2618_v55 = vperm.slane %v2610_v44, 0 }
 0xa97   :  { %v2726_v62 = vrot.slane %v2725_v58, 2  ;;  %v2694_v42 = vsub.f32 %v2629_v38, %v2656_v39  ;;  %v2660_v4 = vrot.slane %v2659_v17, 2  ;;  %vm2626_vm13 = vcmp.ge.s32.totalorder %v4327_v45, %v2618_v55 }
 0xa98   :  { %v2589_v50 = vpop.f32.mrf.mxu3 }
 0xa99   :  { %v2727_v1 = vadd.f32 %v2726_v62, %v2725_v58  ;;  %v2704_v3 = vmul.f32 1.442695, %v2694_v42  ;;  %v2661_v52 = vmax.f32 %v2659_v17, %v2660_v4  ;;  %v2631_v54 = vsel %vm2623_vm10, -1e+30, %v2589_v50 }
 0xa9a   :  { %v2664_v53 = vsel %vm2635_vm6, %v2631_v54, -inf }
 0xa9b   :  { %v2728_v16 = vrot.slane %v2727_v1, 1  ;;  %3311 = vpow2.f32 %v2704_v3  ;;  %v2662_v22 = vrot.slane %v2661_v52, 1  ;;  %v2665_v49 = vrot.slane %v2664_v53, 4 }
 0xa9d   :  { %v2729_v25 = vadd.f32 %v2728_v16, %v2727_v1  ;;  %v2663_v60 = vmax.f32 %v2661_v52, %v2662_v22  ;;  %v2666_v13 = vmax.f32 %v2664_v53, %v2665_v49 }
 0xa9f   :  { %v2695_v61 = vsub.f32 %v2630_v47, %v2663_v60  ;;  %v2667_v35 = vrot.slane %v2666_v13, 2  ;;  %3313 = vrcp.f32 %v2729_v25 }
 0xaa0   :  { %v2592_v20 = vpop.f32.mrf.mxu3 }
 0xaa1   :  { %v4360_v19 = vpop.eup %3311  ;;  %v2706_v15 = vmul.f32 1.442695, %v2695_v61  ;;  %v2668_v21 = vmax.f32 %v2666_v13, %v2667_v35  ;;  %v2632_v32 = vsel %vm2624_vm11, -1e+30, %v2592_v20 }
 0xaa2   :  { %v2730_v27 = vsel %vm2635_vm6, %v4360_v19, 0.0  ;;  %v2671_v24 = vsel %vm2635_vm6, %v2632_v32, -inf }
 0xaa3   :  { %v2731_v10 = vrot.slane %v2730_v27, 4  ;;  %3315 = vpow2.f32 %v2706_v15  ;;  %v2669_v36 = vrot.slane %v2668_v21, 1  ;;  %v2672_v12 = vrot.slane %v2671_v24, 4 }
 0xaa5   :  { %v3314_v26 = vpop.eup %3313  ;;  %v2732_v59 = vadd.f32 %v2731_v10, %v2730_v27  ;;  %v2670_v7 = vmax.f32 %v2668_v21, %v2669_v36  ;;  %v2673_v38 = vmax.f32 %v2671_v24, %v2672_v12 }
 0xaa6   :  { %v2781_v23 = vmul.f32 %v3314_v26, %v3310_v9 }
 0xaa7   :  { %v2733_v43 = vrot.slane %v2732_v59, 2  ;;  %v2696_v33 = vsub.f32 %v2631_v54, %v2670_v7  ;;  %v2674_v18 = vrot.slane %v2673_v38, 2 }
 0xaa8   :  { %2795 = vperm.xlu2 %3156, %v2781_v23   ;;  %v2595_v8 = vpop.f32.mrf.mxu3 }
 0xaa9   :  { %v3316_v37 = vpop.eup %3315  ;;  %v2734_v57 = vadd.f32 %v2733_v43, %v2732_v59  ;;  %v2708_v47 = vmul.f32 1.442695, %v2696_v33  ;;  %v2675_v5 = vmax.f32 %v2673_v38, %v2674_v18  ;;  %v2633_v56 = vsel %vm2625_vm12, -1e+30, %v2595_v8 }
 0xaaa   :  { %v2737_v40 = vsel %vm2635_vm6, %v3316_v37, 0.0  ;;  %v2678_v6 = vsel %vm2635_vm6, %v2633_v56, -inf }
 0xaab   :  { %v2738_v9 = vrot.slane %v2737_v40, 4  ;;  %3317 = vpow2.f32 %v2708_v47  ;;  %v2676_v51 = vrot.slane %v2675_v5, 1  ;;  %v2679_v58 = vrot.slane %v2678_v6, 4 }
 0xaac   :  { %v2735_v41 = vrot.slane %v2734_v57, 1 }
 0xaad   :  { %v2739_v39 = vadd.f32 %v2738_v9, %v2737_v40  ;;  %v2677_v17 = vmax.f32 %v2675_v5, %v2676_v51  ;;  %v2680_v46 = vmax.f32 %v2678_v6, %v2679_v58 }
 0xaae   :  { %v2736_v62 = vadd.f32 %v2735_v41, %v2734_v57 }
 0xaaf   :  { %v2740_v42 = vrot.slane %v2739_v39, 2  ;;  %v2697_v4 = vsub.f32 %v2632_v32, %v2677_v17  ;;  %v2681_v50 = vrot.slane %v2680_v46, 2 }
 0xab0   :  { %v2598_v1 = vpop.f32.mrf.mxu3  ;;  %3319 = vrcp.f32 %v2736_v62 }
 0xab1   :  { %v3318_v3 = vpop.eup %3317  ;;  %v2741_v52 = vadd.f32 %v2740_v42, %v2739_v39  ;;  %v2710_v54 = vmul.f32 1.442695, %v2697_v4  ;;  %v2682_v53 = vmax.f32 %v2680_v46, %v2681_v50  ;;  %v2634_v16 = vsel %vm2626_vm13, -1e+30, %v2598_v1 }
 0xab2   :  { %v2744_v2 = vsel %vm2635_vm6, %v3318_v3, 0.0  ;;  %v2685_v60 = vsel %vm2635_vm6, %v2634_v16, -inf }
 0xab3   :  { %v2742_v22 = vrot.slane %v2741_v52, 1  ;;  %v2745_v49 = vrot.slane %v2744_v2, 4  ;;  %3321 = vpow2.f32 %v2710_v54  ;;  %v2683_v25 = vrot.slane %v2682_v53, 1 }
 0xab4   :  { %v2686_v35 = vrot.slane %v2685_v60, 4 }
 0xab5   :  { %v2743_v13 = vadd.f32 %v2742_v22, %v2741_v52  ;;  %v2746_v34 = vadd.f32 %v2745_v49, %v2744_v2  ;;  %v2684_v61 = vmax.f32 %v2682_v53, %v2683_v25 }
 0xab6   :  { %v3320_v45 = vpop.eup %3319  ;;  %v2687_v21 = vmax.f32 %v2685_v60, %v2686_v35  ;;  %v2791_v60 = vpop.permute.xlu0 %2790 }
 0xab7   :  { %v2747_v20 = vrot.slane %v2746_v34, 2  ;;  %v2698_v15 = vsub.f32 %v2633_v56, %v2684_v61  ;;  %v2782_v32 = vmul.f32 %v3320_v45, %v4360_v19  ;;  %3323 = vrcp.f32 %v2743_v13 }
 0xab8   :  { %v2688_v10 = vrot.slane %v2687_v21, 2  ;;  %v2828_v13 = vmul.f32 %v2791_v60, %v4224_v29 }
 0xab9   :  { %v3322_v27 = vpop.eup %3321  ;;  %v2748_v24 = vadd.f32 %v2747_v20, %v2746_v34  ;;  %v2712_v30 = vmul.f32 1.442695, %v2698_v15  ;;  %2800 = vperm.xlu1 %3157, %v2782_v32  }
 0xaba   :  { %v2751_v36 = vsel %vm2635_vm6, %v3322_v27, 0.0  ;;  %v2689_v26 = vmax.f32 %v2687_v21, %v2688_v10  ;;  %v2836_v20 = vsel %vm96_vm0, %v2828_v13, 0.0 }
 0xabb   :  { %v2752_v12 = vrot.slane %v2751_v36, 4  ;;  %3325 = vpow2.f32 %v2712_v30  ;;  %v2749_v59 = vrot.slane %v2748_v24, 1 }
 0xabc   :  { %v2690_v38 = vrot.slane %v2689_v26, 1 }
 0xabd   :  { %v2753_v7 = vadd.f32 %v2752_v12, %v2751_v36  ;;  %v2750_v23 = vadd.f32 %v2749_v59, %v2748_v24  ;;  %v3324_v44 = vpop.eup %3323  ;;  %v2837_v24 = vrot.slane %v2836_v20, 4 }
 0xabe   :  { %v2691_v33 = vmax.f32 %v2689_v26, %v2690_v38  ;;  %v2783_v18 = vmul.f32 %v3324_v44, %v3316_v37 }
 0xabf   :  { %v2754_v43 = vrot.slane %v2753_v7, 2  ;;  %3327 = vrcp.f32 %v2750_v23  ;;  %v2838_v59 = vadd.f32 %v2837_v24, %v2836_v20 }
 0xac0   :  { %v2699_v57 = vsub.f32 %v2634_v16, %v2691_v33  ;;  %2805 = vperm.xlu2 %3156, %v2783_v18  }
 0xac1   :  { %v3326_v19 = vpop.eup %3325  ;;  %v2755_v8 = vadd.f32 %v2754_v43, %v2753_v7  ;;  %v2839_v43 = vrot.slane %v2838_v59, 2 }
 0xac2   :  { %v2758_v47 = vsel %vm2635_vm6, %v3326_v19, 0.0  ;;  %v2714_v40 = vmul.f32 1.442695, %v2699_v57 }
 0xac3   :  { %v2756_v5 = vrot.slane %v2755_v8, 1  ;;  %v2759_v56 = vrot.slane %v2758_v47, 4 }
 0xac4   :  { %3329 = vpow2.f32 %v2714_v40 }
 0xac5   :  { %v3328_v6 = vpop.eup %3327  ;;  %v2757_v55 = vadd.f32 %v2756_v5, %v2755_v8  ;;  %v2760_v9 = vadd.f32 %v2759_v56, %v2758_v47  ;;  %v2840_v5 = vadd.f32 %v2839_v43, %v2838_v59 }
 0xac6   :  { %v2784_v51 = vmul.f32 %v3328_v6, %v3318_v3 }
 0xac7   :  { %v2761_v58 = vrot.slane %v2760_v9, 2  ;;  %3331 = vrcp.f32 %v2757_v55 }
 0xac8   :  { %2810 = vperm.xlu1 %3157, %v2784_v51   ;;  %v2841_v51 = vrot.slane %v2840_v5, 1 }
 0xac9   :  { %v2762_v41 = vadd.f32 %v2761_v58, %v2760_v9 }
 0xaca   :  { %v3330_v37 = vpop.eup %3329 }
 0xacb   :  { %v2763_v39 = vrot.slane %v2762_v41, 1  ;;  %v2765_v17 = vsel %vm2635_vm6, %v3330_v37, 0.0 }
 0xacc   :  { %v2766_v42 = vrot.slane %v2765_v17, 4 }
 0xacd   :  { %v3332_v46 = vpop.eup %3331  ;;  %v2764_v62 = vadd.f32 %v2763_v39, %v2762_v41 }
 0xace   :  { %v2785_v4 = vmul.f32 %v3332_v46, %v3322_v27  ;;  %v2767_v50 = vadd.f32 %v2766_v42, %v2765_v17 }
 0xacf   :  { %3333 = vrcp.f32 %v2764_v62 }
 0xad0   :  { %2815 = vperm.xlu0 %3155, %v2785_v4   ;;  %v2768_v1 = vrot.slane %v2767_v50, 2  ;;  %v2842_v4 = vadd.f32 %v2841_v51, %v2840_v5 }
 0xad2   :  { %v2769_v52 = vadd.f32 %v2768_v1, %v2767_v50 }
 0xad4   :  { %v2770_v53 = vrot.slane %v2769_v52, 1 }
 0xad5   :  { %v3334_v54 = vpop.eup %3333 }
 0xad6   :  { %v2786_v3 = vmul.f32 %v3334_v54, %v3326_v19  ;;  %v2771_v2 = vadd.f32 %v2770_v53, %v2769_v52 }
 0xad8   :  { %2820 = vperm.xlu2 %3156, %v2786_v3   ;;  %3335 = vrcp.f32 %v2771_v2 }
 0xade   :  { %v3336_v16 = vpop.eup %3335 }
 0xadf   :  { %v2787_v22 = vmul.f32 %v3336_v16, %v3330_v37 }
 0xae1   :  { %2825 = vperm.xlu1 %3157, %v2787_v22  }
 0xb02   :  { %v2796_v49 = vpop.permute.xlu2 %2795 }
 0xb03   :  { %v2829_v34 = vmul.f32 %v2796_v49, %v4278_v31 }
 0xb05   :  { %v2843_v15 = vsel %vm96_vm0, %v2829_v34, 0.0 }
 0xb06   :  { %v2844_v30 = vrot.slane %v2843_v15, 4 }
 0xb08   :  { %v2845_v7 = vadd.f32 %v2844_v30, %v2843_v15 }
 0xb0a   :  { %v2846_v33 = vrot.slane %v2845_v7, 2 }
 0xb0c   :  { %v2847_v56 = vadd.f32 %v2846_v33, %v2845_v7 }
 0xb0e   :  { %v2848_v58 = vrot.slane %v2847_v56, 1 }
 0xb10   :  { %v2849_v50 = vadd.f32 %v2848_v58, %v2847_v56 }
 0xb12   :  { %v2901_v22 = vsel %vm2900_vm14, %v2849_v50, %v2842_v4 }
 0xb1a   :  { %v2806_v61 = vpop.permute.xlu2 %2805 }
 0xb1b   :  { %v2831_v27 = vmul.f32 %v2806_v61, %v4293_v28 }
 0xb1d   :  { %v2857_v12 = vsel %vm96_vm0, %v2831_v27, 0.0 }
 0xb1e   :  { %v2858_v28 = vrot.slane %v2857_v12, 4 }
 0xb20   :  { %v2859_v8 = vadd.f32 %v2858_v28, %v2857_v12 }
 0xb22   :  { %v2860_v55 = vrot.slane %v2859_v8, 2 }
 0xb24   :  { %v2861_v39 = vadd.f32 %v2860_v55, %v2859_v8 }
 0xb26   :  { %v2862_v53 = vrot.slane %v2861_v39, 1 }
 0xb28   :  { %v2863_v13 = vadd.f32 %v2862_v53, %v2861_v39 }
 0xb2b   :  { %v2801_v25 = vpop.permute.xlu1 %2800 }
 0xb2c   :  { %v2830_v35 = vmul.f32 %v2801_v25, %v4283_v11 }
 0xb2e   :  { %v2850_v21 = vsel %vm96_vm0, %v2830_v35, 0.0 }
 0xb2f   :  { %v2851_v29 = vrot.slane %v2850_v21, 4 }
 0xb32   :  { %v2821_v36 = vpop.permute.xlu2 %2820 }
 0xb33   :  { %v2834_v38 = vmul.f32 %v2821_v36, %v4310_v48 }
 0xb35   :  { %v2878_v18 = vsel %vm96_vm0, %v2834_v38, 0.0 }
 0xb36   :  { %v2879_v47 = vrot.slane %v2878_v18, 4 }
 0xb38   :  { %v2880_v48 = vadd.f32 %v2879_v47, %v2878_v18 }
 0xb3a   :  { %v2811_v45 = vpop.permute.xlu1 %2810  ;;  %v2881_v62 = vrot.slane %v2880_v48, 2 }
 0xb3b   :  { %v2832_v32 = vmul.f32 %v2811_v45, %v4299_v14  ;;  %v2852_v14 = vadd.f32 %v2851_v29, %v2850_v21 }
 0xb3c   :  { %v2882_v16 = vadd.f32 %v2881_v62, %v2880_v48 }
 0xb3d   :  { %v2864_v11 = vsel %vm96_vm0, %v2832_v32, 0.0  ;;  %v2853_v19 = vrot.slane %v2852_v14, 2 }
 0xb3e   :  { %v2865_v23 = vrot.slane %v2864_v11, 4  ;;  %v2883_v61 = vrot.slane %v2882_v16, 1 }
 0xb3f   :  { %v2854_v40 = vadd.f32 %v2853_v19, %v2852_v14 }
 0xb40   :  { %v2884_v32 = vadd.f32 %v2883_v61, %v2882_v16 }
 0xb41   :  { %v2855_v41 = vrot.slane %v2854_v40, 1 }
 0xb42   :  { %v2816_v10 = vpop.permute.xlu0 %2815 }
 0xb43   :  { %v2833_v31 = vmul.f32 %v2816_v10, %v4305_v0  ;;  %v2866_v0 = vadd.f32 %v2865_v23, %v2864_v11  ;;  %v2856_v1 = vadd.f32 %v2855_v41, %v2854_v40 }
 0xb45   :  { %v2871_v26 = vsel %vm96_vm0, %v2833_v31, 0.0  ;;  %v2867_v6 = vrot.slane %v2866_v0, 2  ;;  %v2903_v25 = vsel %vm2902_vm15, %v2856_v1, %v2901_v22 }
 0xb46   :  { %v2872_v44 = vrot.slane %v2871_v26, 4  ;;  %v2905_v35 = vsel %vm2904_vm1, %v2863_v13, %v2903_v25 }
 0xb47   :  { %v2868_v37 = vadd.f32 %v2867_v6, %v2866_v0 }
 0xb48   :  { %v2873_v57 = vadd.f32 %v2872_v44, %v2871_v26 }
 0xb49   :  { %v2869_v52 = vrot.slane %v2868_v37, 1 }
 0xb4a   :  { %v2874_v9 = vrot.slane %v2873_v57, 2 }
 0xb4b   :  { %v2870_v60 = vadd.f32 %v2869_v52, %v2868_v37 }
 0xb4c   :  { %v2875_v17 = vadd.f32 %v2874_v9, %v2873_v57 }
 0xb4d   :  { %v2907_v20 = vsel %vm2906_vm2, %v2870_v60, %v2905_v35 }
 0xb4e   :  { %v2876_v3 = vrot.slane %v2875_v17, 1 }
 0xb53   :  { %v2826_v46 = vpop.permute.xlu1 %2825 }
 0xb54   :  { %v2835_v42 = vmul.f32 %v2826_v46, %v4315_v63  ;;  %v2877_v63 = vadd.f32 %v2876_v3, %v2875_v17 }
 0xb56   :  { %v2885_v54 = vsel %vm96_vm0, %v2835_v42, 0.0  ;;  %v2909_v21 = vsel %vm2908_vm3, %v2877_v63, %v2907_v20 }
 0xb57   :  { %v2886_v2 = vrot.slane %v2885_v54, 4  ;;  %v2911_v24 = vsel %vm2910_vm4, %v2884_v32, %v2909_v21 }
 0xb59   :  { %v2887_v49 = vadd.f32 %v2886_v2, %v2885_v54 }
 0xb5b   :  { %v2888_v34 = vrot.slane %v2887_v49, 2 }
 0xb5d   :  { %v2889_v45 = vadd.f32 %v2888_v34, %v2887_v49 }
 0xb5f   :  { %v2890_v15 = vrot.slane %v2889_v45, 1 }
 0xb61   :  { %v2891_v27 = vadd.f32 %v2890_v15, %v2889_v45 }
 0xb63   :  { %v2913_v30 = vsel %vm2912_vm5, %v2891_v27, %v2911_v24 }
 0xb64   :  { %2915 = vst.msk [vmem:[#allocation8] sm:$0xff] %vm96_vm0, %v2913_v30 }
 0xb65   :  { %2926 = dma.vmem_to_hbm [thread:$0]  %s2922_s24, 128, %s2924_s25, [#allocation4]  }
 0xb66   :  { %3437 = dma.done.wait [#allocation4], 128  }
 0xb67   :  { %3438 = vsyncadd [#allocation4], 4294967168 }
 0xb68   :  { %2931 = vsyncpa [#allocation3], 1 }
 0xb69   :  { %2932 = vsyncpa [#allocation6], 1 }
 0xb6a   :  { %2933 = vsyncpa [#allocation4], 1 }

</bundles_post_ra>
